<compile_context>
chip_gen: v6e
topology: v6e:2x2x1
jax: 0.10.0
libtpu: 0.0.40
codegen_flags: <defaults>
</compile_context>

<pallas_src>
import jax
import jax.numpy as jnp
from jax.experimental import pallas as pl
from jax.experimental.pallas import tpu as pltpu


def decoder_step_kernel(
    # inputs
    enc_ref, enc_att_ref, gates_emb_ref, len_ref,
    w_ha_ref, b_ha_ref, w_ca_ref, b_ca_ref, w_beta_ref, b_beta_ref,
    w_ih_enc_ref, w_hh_ref, b_hh_ref,
    w_ih0_ref, b_ih0_ref, w_ic0_ref, b_ic0_ref,
    # outputs (fc head is computed in the wrapper from h_out)
    h_out_ref, alphas_ref,
    # scratch: recurrent state, persists across the (inner) time grid axis
    h_sc, c_sc):
    t = pl.program_id(1)                    # time step (inner, "arbitrary")
    enc = enc_ref[...]                      # [tb, N, E]  bf16
    tb, N, E = enc.shape
    H = h_sc.shape[-1]

    # ---- init_lstm_state: once per batch block (t == 0) ----
    @pl.when(t == 0)
    def _init_state():
        enc_mean = jnp.mean(enc.astype(jnp.float32), axis=1).astype(enc.dtype)
        h_sc[...] = (jnp.dot(enc_mean, w_ih0_ref[...],
                             preferred_element_type=jnp.float32)
                     + b_ih0_ref[...])
        c_sc[...] = (jnp.dot(enc_mean, w_ic0_ref[...],
                             preferred_element_type=jnp.float32)
                     + b_ic0_ref[...])

    h = h_sc[...]                           # [tb, H] f32
    c = c_sc[...]                           # [tb, H] f32
    h_b = h.astype(enc.dtype)               # bf16 operand for MXU matmuls

    # ---- Attention (encoder projection was hoisted out of the loop) ----
    enc_att = enc_att_ref[...].astype(jnp.float32)                    # [tb,N,A]
    hid_att = (jnp.dot(h_b, w_ha_ref[...],
                       preferred_element_type=jnp.float32)
               + b_ha_ref[...])                                       # [tb,A]
    # TODO(synk): at production N/A, chunk this [tb,N,A] intermediate over N.
    comb = jnp.maximum(enc_att + hid_att[:, None, :], 0.0)            # ReLU
    # combineAttentionLayer: Linear(A, 1) as a lane reduction
    scores = (jnp.sum(comb * w_ca_ref[...][None, :, :], axis=-1)
              + b_ca_ref[...])                                        # [tb,N]
    m = jnp.max(scores, axis=-1, keepdims=True)
    ex = jnp.exp(scores - m)
    alpha = ex / jnp.sum(ex, axis=-1, keepdims=True)                  # softmax

    # attended context as a batched MXU matmul (instead of a VPU/XLU reduce)
    weighted = jnp.einsum(
        'bqn,bne->bqe', alpha.astype(enc.dtype)[:, None, :], enc,
        preferred_element_type=jnp.float32).reshape(tb, E)            # [tb,E]
    beta_gate = jax.nn.sigmoid(
        jnp.dot(h_b, w_beta_ref[...], preferred_element_type=jnp.float32)
        + b_beta_ref[...])                                            # [tb,E]
    weighted = beta_gate * weighted

    # ---- LSTMCell; embedding half of the gates precomputed for all steps ----
    gates = (gates_emb_ref[...].astype(jnp.float32)                   # emb@W+b_ih
             + jnp.dot(weighted.astype(enc.dtype), w_ih_enc_ref[...],
                       preferred_element_type=jnp.float32)
             + jnp.dot(h_b, w_hh_ref[...],
                       preferred_element_type=jnp.float32)
             + b_hh_ref[...])                                         # [tb,4H]
    i_g = jax.nn.sigmoid(gates[:, 0 * H:1 * H])
    f_g = jax.nn.sigmoid(gates[:, 1 * H:2 * H])
    g_g = jnp.tanh(gates[:, 2 * H:3 * H])
    o_g = jax.nn.sigmoid(gates[:, 3 * H:4 * H])
    c_new = f_g * c + i_g * g_g
    h_new = o_g * jnp.tanh(c_new)

    # active-row mask from decode lengths (equivalent to the reference's
    # batch_size_max_L slicing); single vsel blend for the carried state.
    active = len_ref[...] > t                                         # [tb,1]
    h_sc[...] = jnp.where(active, h_new, h)
    c_sc[...] = jnp.where(active, c_new, c)

    # Outputs: raw h_new / alpha; the fc GEMM and the per-(t,b) output masking
    # happen in the wrapper, off the recurrent critical path.
    # TODO(synk): nn.Dropout(p=0.5) treated as eval-mode identity.
    h_out_ref[...] = h_new.astype(h_out_ref.dtype)
    alphas_ref[...] = alpha


def make_params(key, *, attention_dim, embed_dim, hidden_dim, vocab_size,
                encoder_dim):
    ks = jax.random.split(key, 10)

    def lin(k, fan_in, fan_out):
        kw, kb = jax.random.split(k)
        bound = 1.0 / jnp.sqrt(jnp.float32(fan_in))
        w = jax.random.uniform(kw, (fan_in, fan_out), jnp.float32, -bound, bound)
        b = jax.random.uniform(kb, (1, fan_out), jnp.float32, -bound, bound)
        return w, b

    p = {}
    p['w_ea'], p['b_ea'] = lin(ks[0], encoder_dim, attention_dim)
    p['w_ha'], p['b_ha'] = lin(ks[1], hidden_dim, attention_dim)
    w_ca, b_ca = lin(ks[2], attention_dim, 1)
    p['w_ca'] = w_ca.T                                    # stored as [1, A]
    p['b_ca'] = b_ca                                      # [1, 1]
    p['w_beta'], p['b_beta'] = lin(ks[3], hidden_dim, encoder_dim)
    p['w_ih'], p['b_ih'] = lin(ks[4], embed_dim + encoder_dim, 4 * hidden_dim)
    p['w_hh'], p['b_hh'] = lin(ks[5], hidden_dim, 4 * hidden_dim)
    p['w_ih0'], p['b_ih0'] = lin(ks[6], encoder_dim, hidden_dim)
    p['w_ic0'], p['b_ic0'] = lin(ks[7], encoder_dim, hidden_dim)
    # fc: matches Decoder.init_weights -> bias 0, weight ~ U(-0.1, 0.1)
    p['w_fc'] = jax.random.uniform(ks[8], (hidden_dim, vocab_size),
                                   jnp.float32, -0.1, 0.1)
    p['b_fc'] = jnp.zeros((1, vocab_size), jnp.float32)
    # synthetic frozen "w2v" embedding table
    p['embedding'] = jax.random.normal(ks[9], (vocab_size, embed_dim),
                                       jnp.float32)
    return p


def decoder_forward(params, encoder_out, encoded_captions, caption_lengths,
                    *, block_b=None):
    B, N, E = encoder_out.shape
    V, Emb = params['embedding'].shape
    H = params['w_hh'].shape[0]
    A = params['w_ea'].shape[1]
    T = int(max(caption_lengths)) - 1                    # decode steps
    lengths = jnp.asarray(caption_lengths, jnp.int32) - 1
    cdt = jnp.bfloat16                                   # MXU operand dtype

    # ---- time-invariant precompute, hoisted out of the recurrence ----
    enc_f32 = encoder_out.astype(jnp.float32)
    # encoder attention projection (identical every step)
    enc_att = jnp.einsum('bne,ea->bna', enc_f32, params['w_ea']) + params['b_ea']
    # embedding half of the LSTM gates for all timesteps (b_ih folded in)
    emb = params['embedding'][encoded_captions]           # [B, L, Emb]
    emb_tbe = jnp.transpose(emb[:, :T, :], (1, 0, 2)).astype(jnp.float32)
    w_ih_emb = params['w_ih'][:Emb, :]
    w_ih_enc = params['w_ih'][Emb:, :]
    gates_emb = jnp.einsum('tbe,eh->tbh', emb_tbe, w_ih_emb) + params['b_ih']

    len_col = lengths[:, None]                            # [B, 1] int32

    if block_b is None:
        # Production / v7x: choose block_b <= B/2 (and a multiple of 8) so the
        # "parallel" batch axis shards across both TensorCores, sized from the
        # per-block resident footprint (~N*(2E+2A) bf16 bytes per row).
        block_b = B
    assert B % block_b == 0
    nb = B // block_b

    bf = lambda x: x.astype(cdt)

    # blocks that never change across time are single-buffered (Buffered(1))
    def resident(shape):
        nd = len(shape)
        return pl.BlockSpec(shape, lambda i, t, _n=nd: (0,) * _n,
                            pipeline_mode=pl.Buffered(1))

    def batch_resident(shape):     # changes only with the (outer) batch block
        nd = len(shape)
        return pl.BlockSpec(shape, lambda i, t, _n=nd: (i,) + (0,) * (_n - 1),
                            pipeline_mode=pl.Buffered(1))

    # per-step blocks: leading time dim squeezed out of the kernel view
    def per_step(last):
        return pl.BlockSpec((pl.Squeezed(), block_b, last),
                            lambda i, t: (t, i, 0))

    in_specs = [
        batch_resident((block_b, N, E)),                  # encoder_out (bf16)
        batch_resident((block_b, N, A)),                  # hoisted enc_att (bf16)
        per_step(4 * H),                                  # precomputed emb gates
        batch_resident((block_b, 1)),                     # decode lengths
        resident((H, A)), resident((1, A)),               # w_ha, b_ha
        resident((1, A)), resident((1, 1)),               # w_ca, b_ca
        resident((H, E)), resident((1, E)),               # w_beta, b_beta
        resident((E, 4 * H)),                             # w_ih (encoder half)
        resident((H, 4 * H)), resident((1, 4 * H)),       # w_hh, b_hh
        resident((E, H)), resident((1, H)),               # init_h
        resident((E, H)), resident((1, H)),               # init_c
    ]
    # TODO(synk): at production shapes pad H and N up to multiples of 128 so
    # these per-step output stores are lane-dense (unmasked vst).
    out_specs = [per_step(H), per_step(N)]
    out_shape = [jax.ShapeDtypeStruct((T, B, H), cdt),        # hidden states
                 jax.ShapeDtypeStruct((T, B, N), jnp.float32)]  # attention maps
    scratch = [pltpu.VMEM((block_b, H), jnp.float32),     # h state
               pltpu.VMEM((block_b, H), jnp.float32)]     # c state

    h_tbh, alphas_tbn = pl.pallas_call(
        decoder_step_kernel,
        out_shape=out_shape,
        grid_spec=pltpu.PrefetchScalarGridSpec(
            num_scalar_prefetch=0,
            grid=(nb, T),                                 # batch outer, time inner
            in_specs=in_specs,
            out_specs=out_specs,
            scratch_shapes=scratch),
        compiler_params=pltpu.CompilerParams(
            dimension_semantics=("parallel", "arbitrary")),
    )(bf(encoder_out), bf(enc_att), bf(gates_emb), len_col,
      bf(params['w_ha']), params['b_ha'],
      params['w_ca'], params['b_ca'],
      bf(params['w_beta']), params['b_beta'],
      bf(w_ih_enc), bf(params['w_hh']), params['b_hh'],
      bf(params['w_ih0']), params['b_ih0'],
      bf(params['w_ic0']), params['b_ic0'])

    # ---- fc head hoisted off the recurrence: one MXU-saturating GEMM over all
    # timesteps, then mask inactive (t >= length) rows to zero as the torch
    # reference leaves them.
    preds_tbv = (jnp.einsum('tbh,hv->tbv', h_tbh, bf(params['w_fc']),
                            preferred_element_type=jnp.float32)
                 + params['b_fc'])                                    # [T,B,V]
    mask_bt = lengths[:, None] > jnp.arange(T)[None, :]               # [B,T]
    predictions = jnp.where(mask_bt[:, :, None],
                            jnp.transpose(preds_tbv, (1, 0, 2)), 0.0)  # [B,T,V]
    alphas = jnp.where(mask_bt[:, :, None],
                       jnp.transpose(alphas_tbn, (1, 0, 2)), 0.0)      # [B,T,N]
    token_ids = jnp.argmax(predictions, axis=2)                        # [B,T]
    return predictions, token_ids, alphas


if __name__ == "__main__":
    # small shapes consistent with the module's forward:
    #   B=2 captions, N=16 encoder regions, encoder_dim=32, attention_dim=16,
    #   embed_dim=16, hidden_dim=32, vocab_size=64
    B, N, E = 2, 16, 32
    A, Emb, H, V = 16, 16, 32, 64

    key = jax.random.PRNGKey(0)
    k_params, k_enc, k_cap = jax.random.split(key, 3)
    params = make_params(k_params, attention_dim=A, embed_dim=Emb,
                         hidden_dim=H, vocab_size=V, encoder_dim=E)

    encoder_out = jax.random.normal(k_enc, (B, N, E), jnp.float32)
    caption_lengths = [6, 4]                               # sorted descending
    max_len = max(caption_lengths)
    encoded_captions = jax.random.randint(k_cap, (B, max_len), 0, V, jnp.int32)

    predictions, token_ids, alphas = decoder_forward(
        params, encoder_out, encoded_captions, caption_lengths)
    jax.block_until_ready((predictions, token_ids, alphas))

    assert predictions.shape == (B, max_len - 1, V)
    assert token_ids.shape == (B, max_len - 1)
    assert alphas.shape == (B, max_len - 1, N)
    print("KERNEL_OK")
</pallas_src>

<mosaic_0001>
module attributes {stable_mosaic.version = 11 : i64} {
  func.func @decoder_step_kernel(%arg0: i32, %arg1: i32, %arg2: memref<2x16x32xbf16, #tpu.memory_space<vmem>>, %arg3: memref<2x16x16xbf16, #tpu.memory_space<vmem>>, %arg4: memref<1x2x128xbf16, #tpu.memory_space<vmem>>, %arg5: memref<2x1xi32, #tpu.memory_space<vmem>>, %arg6: memref<32x16xbf16, #tpu.memory_space<vmem>>, %arg7: memref<1x16xf32, #tpu.memory_space<vmem>>, %arg8: memref<1x16xf32, #tpu.memory_space<vmem>>, %arg9: memref<1x1xf32, #tpu.memory_space<vmem>>, %arg10: memref<32x32xbf16, #tpu.memory_space<vmem>>, %arg11: memref<1x32xf32, #tpu.memory_space<vmem>>, %arg12: memref<32x128xbf16, #tpu.memory_space<vmem>>, %arg13: memref<32x128xbf16, #tpu.memory_space<vmem>>, %arg14: memref<1x128xf32, #tpu.memory_space<vmem>>, %arg15: memref<32x32xbf16, #tpu.memory_space<vmem>>, %arg16: memref<1x32xf32, #tpu.memory_space<vmem>>, %arg17: memref<32x32xbf16, #tpu.memory_space<vmem>>, %arg18: memref<1x32xf32, #tpu.memory_space<vmem>>, %arg19: memref<1x2x32xbf16, #tpu.memory_space<vmem>>, %arg20: memref<1x2x16xf32, #tpu.memory_space<vmem>>, %arg21: memref<2x32xf32, #tpu.memory_space<vmem>>, %arg22: memref<2x32xf32, #tpu.memory_space<vmem>>) attributes {dimension_semantics = [#tpu.dimension_semantics<parallel>, #tpu.dimension_semantics<arbitrary>], iteration_bounds = array<i64: 1, 5>, scalar_prefetch = 0 : i64, scratch_operands = 2 : i64, tpu.core_type = #tpu.core_type<tc>, window_params = [{pipeline_mode = #tpu.pipeline_mode<synchronous>, transform_indices = @transform_0, window_bounds = array<i64: 2, 16, 32>}, {pipeline_mode = #tpu.pipeline_mode<synchronous>, transform_indices = @transform_1, window_bounds = array<i64: 2, 16, 16>}, {transform_indices = @transform_2, window_bounds = array<i64: 1, 2, 128>}, {pipeline_mode = #tpu.pipeline_mode<synchronous>, transform_indices = @transform_3, window_bounds = array<i64: 2, 1>}, {pipeline_mode = #tpu.pipeline_mode<synchronous>, transform_indices = @transform_4, window_bounds = array<i64: 32, 16>}, {pipeline_mode = #tpu.pipeline_mode<synchronous>, transform_indices = @transform_5, window_bounds = array<i64: 1, 16>}, {pipeline_mode = #tpu.pipeline_mode<synchronous>, transform_indices = @transform_6, window_bounds = array<i64: 1, 16>}, {pipeline_mode = #tpu.pipeline_mode<synchronous>, transform_indices = @transform_7, window_bounds = array<i64: 1, 1>}, {pipeline_mode = #tpu.pipeline_mode<synchronous>, transform_indices = @transform_8, window_bounds = array<i64: 32, 32>}, {pipeline_mode = #tpu.pipeline_mode<synchronous>, transform_indices = @transform_9, window_bounds = array<i64: 1, 32>}, {pipeline_mode = #tpu.pipeline_mode<synchronous>, transform_indices = @transform_10, window_bounds = array<i64: 32, 128>}, {pipeline_mode = #tpu.pipeline_mode<synchronous>, transform_indices = @transform_11, window_bounds = array<i64: 32, 128>}, {pipeline_mode = #tpu.pipeline_mode<synchronous>, transform_indices = @transform_12, window_bounds = array<i64: 1, 128>}, {pipeline_mode = #tpu.pipeline_mode<synchronous>, transform_indices = @transform_13, window_bounds = array<i64: 32, 32>}, {pipeline_mode = #tpu.pipeline_mode<synchronous>, transform_indices = @transform_14, window_bounds = array<i64: 1, 32>}, {pipeline_mode = #tpu.pipeline_mode<synchronous>, transform_indices = @transform_15, window_bounds = array<i64: 32, 32>}, {pipeline_mode = #tpu.pipeline_mode<synchronous>, transform_indices = @transform_16, window_bounds = array<i64: 1, 32>}, {transform_indices = @transform_17, window_bounds = array<i64: 1, 2, 32>}, {transform_indices = @transform_18, window_bounds = array<i64: 1, 2, 16>}]} {
    %c0 = arith.constant 0 : index
    %c0_0 = arith.constant 0 : index
    %c0_1 = arith.constant 0 : index
    %0 = vector.load %arg2[%c0, %c0_0, %c0_1] : memref<2x16x32xbf16, #tpu.memory_space<vmem>>, vector<2x16x32xbf16>
    %c0_i32 = arith.constant 0 : i32
    %1 = arith.cmpi eq, %arg1, %c0_i32 : i32
    %2 = arith.extui %1 : i1 to i32
    %c0_i32_2 = arith.constant 0 : i32
    %3 = arith.cmpi ne, %2, %c0_i32_2 : i32
    scf.if %3 {
      %107 = arith.extf %0 : vector<2x16x32xbf16> to vector<2x16x32xf32>
      %cst_55 = arith.constant dense<0.000000e+00> : vector<2x32xf32>
      %108 = vector.multi_reduction <add>, %107, %cst_55 [1] : vector<2x16x32xf32> to vector<2x32xf32>
      %cst_56 = arith.constant 1.600000e+01 : f32
      %109 = vector.broadcast %cst_56 : f32 to vector<2x32xf32>
      %110 = arith.divf %108, %109 : vector<2x32xf32>
      %111 = arith.truncf %110 : vector<2x32xf32> to vector<2x32xbf16>
      %c0_57 = arith.constant 0 : index
      %c0_58 = arith.constant 0 : index
      %112 = vector.load %arg15[%c0_57, %c0_58] : memref<32x32xbf16, #tpu.memory_space<vmem>>, vector<32x32xbf16>
      %cst_59 = arith.constant dense<0.000000e+00> : vector<2x32xf32>
      %113 = tpu.matmul %111, %112, %cst_59 {dimension_numbers = #tpu.dot_dimension_numbers<[1], [0], [0], [1], [0, 0, 1, 1], [], []>} : vector<2x32xbf16>, vector<32x32xbf16>, vector<2x32xf32> -> vector<2x32xf32>
      %c0_60 = arith.constant 0 : index
      %c0_61 = arith.constant 0 : index
      %114 = vector.load %arg16[%c0_60, %c0_61] : memref<1x32xf32, #tpu.memory_space<vmem>>, vector<1x32xf32>
      %115 = vector.broadcast %114 : vector<1x32xf32> to vector<2x32xf32>
      %116 = arith.addf %113, %115 : vector<2x32xf32>
      %c0_62 = arith.constant 0 : index
      %c0_63 = arith.constant 0 : index
      %117 = vector.load %arg21[%c0_62, %c0_63] : memref<2x32xf32, #tpu.memory_space<vmem>>, vector<2x32xf32>
      tpu.vector_store %arg21[%c0_62, %c0_63], %116 {strides = array<i32>} : memref<2x32xf32, #tpu.memory_space<vmem>>, vector<2x32xf32>,
      %c0_64 = arith.constant 0 : index
      %c0_65 = arith.constant 0 : index
      %118 = vector.load %arg17[%c0_64, %c0_65] : memref<32x32xbf16, #tpu.memory_space<vmem>>, vector<32x32xbf16>
      %cst_66 = arith.constant dense<0.000000e+00> : vector<2x32xf32>
      %119 = tpu.matmul %111, %118, %cst_66 {dimension_numbers = #tpu.dot_dimension_numbers<[1], [0], [0], [1], [0, 0, 1, 1], [], []>} : vector<2x32xbf16>, vector<32x32xbf16>, vector<2x32xf32> -> vector<2x32xf32>
      %c0_67 = arith.constant 0 : index
      %c0_68 = arith.constant 0 : index
      %120 = vector.load %arg18[%c0_67, %c0_68] : memref<1x32xf32, #tpu.memory_space<vmem>>, vector<1x32xf32>
      %121 = vector.broadcast %120 : vector<1x32xf32> to vector<2x32xf32>
      %122 = arith.addf %119, %121 : vector<2x32xf32>
      %c0_69 = arith.constant 0 : index
      %c0_70 = arith.constant 0 : index
      %123 = vector.load %arg22[%c0_69, %c0_70] : memref<2x32xf32, #tpu.memory_space<vmem>>, vector<2x32xf32>
      tpu.vector_store %arg22[%c0_69, %c0_70], %122 {strides = array<i32>} : memref<2x32xf32, #tpu.memory_space<vmem>>, vector<2x32xf32>,
    } else {
    }
    %c0_3 = arith.constant 0 : index
    %c0_4 = arith.constant 0 : index
    %4 = vector.load %arg21[%c0_3, %c0_4] : memref<2x32xf32, #tpu.memory_space<vmem>>, vector<2x32xf32>
    %c0_5 = arith.constant 0 : index
    %c0_6 = arith.constant 0 : index
    %5 = vector.load %arg22[%c0_5, %c0_6] : memref<2x32xf32, #tpu.memory_space<vmem>>, vector<2x32xf32>
    %6 = arith.truncf %4 : vector<2x32xf32> to vector<2x32xbf16>
    %c0_7 = arith.constant 0 : index
    %c0_8 = arith.constant 0 : index
    %c0_9 = arith.constant 0 : index
    %7 = vector.load %arg3[%c0_7, %c0_8, %c0_9] : memref<2x16x16xbf16, #tpu.memory_space<vmem>>, vector<2x16x16xbf16>
    %8 = arith.extf %7 : vector<2x16x16xbf16> to vector<2x16x16xf32>
    %c0_10 = arith.constant 0 : index
    %c0_11 = arith.constant 0 : index
    %9 = vector.load %arg6[%c0_10, %c0_11] : memref<32x16xbf16, #tpu.memory_space<vmem>>, vector<32x16xbf16>
    %cst = arith.constant dense<0.000000e+00> : vector<2x16xf32>
    %10 = tpu.matmul %6, %9, %cst {dimension_numbers = #tpu.dot_dimension_numbers<[1], [0], [0], [1], [0, 0, 1, 1], [], []>} : vector<2x32xbf16>, vector<32x16xbf16>, vector<2x16xf32> -> vector<2x16xf32>
    %c0_12 = arith.constant 0 : index
    %c0_13 = arith.constant 0 : index
    %11 = vector.load %arg7[%c0_12, %c0_13] : memref<1x16xf32, #tpu.memory_space<vmem>>, vector<1x16xf32>
    %12 = vector.broadcast %11 : vector<1x16xf32> to vector<2x16xf32>
    %13 = arith.addf %10, %12 : vector<2x16xf32>
    %14 = vector.shape_cast %13 : vector<2x16xf32> to vector<2x1x16xf32>
    %15 = vector.broadcast %14 : vector<2x1x16xf32> to vector<2x16x16xf32>
    %16 = arith.addf %8, %15 : vector<2x16x16xf32>
    %cst_14 = arith.constant 0.000000e+00 : f32
    %17 = vector.broadcast %cst_14 : f32 to vector<2x16x16xf32>
    %18 = arith.maximumf %16, %17 : vector<2x16x16xf32>
    %c0_15 = arith.constant 0 : index
    %c0_16 = arith.constant 0 : index
    %19 = vector.load %arg8[%c0_15, %c0_16] : memref<1x16xf32, #tpu.memory_space<vmem>>, vector<1x16xf32>
    %20 = vector.shape_cast %19 : vector<1x16xf32> to vector<1x1x16xf32>
    %21 = vector.broadcast %20 : vector<1x1x16xf32> to vector<2x16x16xf32>
    %22 = arith.mulf %18, %21 : vector<2x16x16xf32>
    %cst_17 = arith.constant dense<0.000000e+00> : vector<2x16xf32>
    %23 = vector.multi_reduction <add>, %22, %cst_17 [2] : vector<2x16x16xf32> to vector<2x16xf32>
    %c0_18 = arith.constant 0 : index
    %c0_19 = arith.constant 0 : index
    %24 = vector.load %arg9[%c0_18, %c0_19] : memref<1x1xf32, #tpu.memory_space<vmem>>, vector<1x1xf32>
    %25 = vector.broadcast %24 : vector<1x1xf32> to vector<2x16xf32>
    %26 = arith.addf %23, %25 : vector<2x16xf32>
    %cst_20 = arith.constant dense<0xFF800000> : vector<2xf32>
    %27 = vector.multi_reduction <maximumf>, %26, %cst_20 [1] : vector<2x16xf32> to vector<2xf32>
    %28 = vector.shape_cast %27 : vector<2xf32> to vector<2x1xf32>
    %29 = vector.broadcast %28 : vector<2x1xf32> to vector<2x16xf32>
    %30 = arith.subf %26, %29 : vector<2x16xf32>
    %31 = math.exp %30 : vector<2x16xf32>
    %cst_21 = arith.constant dense<0.000000e+00> : vector<2xf32>
    %32 = vector.multi_reduction <add>, %31, %cst_21 [1] : vector<2x16xf32> to vector<2xf32>
    %33 = vector.shape_cast %32 : vector<2xf32> to vector<2x1xf32>
    %34 = vector.broadcast %33 : vector<2x1xf32> to vector<2x16xf32>
    %35 = arith.divf %31, %34 : vector<2x16xf32>
    %36 = arith.truncf %35 : vector<2x16xf32> to vector<2x16xbf16>
    %37 = vector.shape_cast %36 : vector<2x16xbf16> to vector<2x1x16xbf16>
    "tpu.trace_start"() <{level = 10 : i32, message = "bqn,bne->bqe"}> : () -> ()
    %cst_22 = arith.constant dense<0.000000e+00> : vector<2x1x32xf32>
    %38 = tpu.matmul %37, %0, %cst_22 {dimension_numbers = #tpu.dot_dimension_numbers<[2], [1], [1], [2], [0, 0, 0, 1, 1, 2], [0], [0]>} : vector<2x1x16xbf16>, vector<2x16x32xbf16>, vector<2x1x32xf32> -> vector<2x1x32xf32>
    "tpu.trace_stop"() : () -> ()
    %39 = vector.shape_cast %38 : vector<2x1x32xf32> to vector<2x32xf32>
    %c0_23 = arith.constant 0 : index
    %c0_24 = arith.constant 0 : index
    %40 = vector.load %arg10[%c0_23, %c0_24] : memref<32x32xbf16, #tpu.memory_space<vmem>>, vector<32x32xbf16>
    %cst_25 = arith.constant dense<0.000000e+00> : vector<2x32xf32>
    %41 = tpu.matmul %6, %40, %cst_25 {dimension_numbers = #tpu.dot_dimension_numbers<[1], [0], [0], [1], [0, 0, 1, 1], [], []>} : vector<2x32xbf16>, vector<32x32xbf16>, vector<2x32xf32> -> vector<2x32xf32>
    %c0_26 = arith.constant 0 : index
    %c0_27 = arith.constant 0 : index
    %42 = vector.load %arg11[%c0_26, %c0_27] : memref<1x32xf32, #tpu.memory_space<vmem>>, vector<1x32xf32>
    %43 = vector.broadcast %42 : vector<1x32xf32> to vector<2x32xf32>
    %44 = arith.addf %41, %43 : vector<2x32xf32>
    %45 = arith.negf %44 : vector<2x32xf32>
    %46 = math.exp %45 : vector<2x32xf32>
    %cst_28 = arith.constant 1.000000e+00 : f32
    %47 = vector.broadcast %cst_28 : f32 to vector<2x32xf32>
    %48 = arith.addf %47, %46 : vector<2x32xf32>
    %49 = arith.divf %47, %48 : vector<2x32xf32>
    %50 = arith.mulf %49, %39 : vector<2x32xf32>
    %c0_29 = arith.constant 0 : index
    %c0_30 = arith.constant 0 : index
    %c0_31 = arith.constant 0 : index
    %51 = vector.load %arg4[%c0_29, %c0_30, %c0_31] : memref<1x2x128xbf16, #tpu.memory_space<vmem>>, vector<1x2x128xbf16>
    %52 = vector.shape_cast %51 : vector<1x2x128xbf16> to vector<2x128xbf16>
    %53 = arith.extf %52 : vector<2x128xbf16> to vector<2x128xf32>
    %54 = arith.truncf %50 : vector<2x32xf32> to vector<2x32xbf16>
    %c0_32 = arith.constant 0 : index
    %c0_33 = arith.constant 0 : index
    %55 = vector.load %arg12[%c0_32, %c0_33] : memref<32x128xbf16, #tpu.memory_space<vmem>>, vector<32x128xbf16>
    %cst_34 = arith.constant dense<0.000000e+00> : vector<2x128xf32>
    %56 = tpu.matmul %54, %55, %cst_34 {dimension_numbers = #tpu.dot_dimension_numbers<[1], [0], [0], [1], [0, 0, 1, 1], [], []>} : vector<2x32xbf16>, vector<32x128xbf16>, vector<2x128xf32> -> vector<2x128xf32>
    %57 = arith.addf %53, %56 : vector<2x128xf32>
    %c0_35 = arith.constant 0 : index
    %c0_36 = arith.constant 0 : index
    %58 = vector.load %arg13[%c0_35, %c0_36] : memref<32x128xbf16, #tpu.memory_space<vmem>>, vector<32x128xbf16>
    %cst_37 = arith.constant dense<0.000000e+00> : vector<2x128xf32>
    %59 = tpu.matmul %6, %58, %cst_37 {dimension_numbers = #tpu.dot_dimension_numbers<[1], [0], [0], [1], [0, 0, 1, 1], [], []>} : vector<2x32xbf16>, vector<32x128xbf16>, vector<2x128xf32> -> vector<2x128xf32>
    %60 = arith.addf %57, %59 : vector<2x128xf32>
    %c0_38 = arith.constant 0 : index
    %c0_39 = arith.constant 0 : index
    %61 = vector.load %arg14[%c0_38, %c0_39] : memref<1x128xf32, #tpu.memory_space<vmem>>, vector<1x128xf32>
    %62 = vector.broadcast %61 : vector<1x128xf32> to vector<2x128xf32>
    %63 = arith.addf %60, %62 : vector<2x128xf32>
    %64 = vector.extract_strided_slice %63 {offsets = [0, 0], sizes = [2, 32], strides = [1, 1]} : vector<2x128xf32> to vector<2x32xf32>
    %65 = arith.negf %64 : vector<2x32xf32>
    %66 = math.exp %65 : vector<2x32xf32>
    %cst_40 = arith.constant 1.000000e+00 : f32
    %67 = vector.broadcast %cst_40 : f32 to vector<2x32xf32>
    %68 = arith.addf %67, %66 : vector<2x32xf32>
    %69 = arith.divf %67, %68 : vector<2x32xf32>
    %70 = vector.extract_strided_slice %63 {offsets = [0, 32], sizes = [2, 32], strides = [1, 1]} : vector<2x128xf32> to vector<2x32xf32>
    %71 = arith.negf %70 : vector<2x32xf32>
    %72 = math.exp %71 : vector<2x32xf32>
    %cst_41 = arith.constant 1.000000e+00 : f32
    %73 = vector.broadcast %cst_41 : f32 to vector<2x32xf32>
    %74 = arith.addf %73, %72 : vector<2x32xf32>
    %75 = arith.divf %73, %74 : vector<2x32xf32>
    %76 = vector.extract_strided_slice %63 {offsets = [0, 64], sizes = [2, 32], strides = [1, 1]} : vector<2x128xf32> to vector<2x32xf32>
    %77 = math.tanh %76 : vector<2x32xf32>
    %78 = vector.extract_strided_slice %63 {offsets = [0, 96], sizes = [2, 32], strides = [1, 1]} : vector<2x128xf32> to vector<2x32xf32>
    %79 = arith.negf %78 : vector<2x32xf32>
    %80 = math.exp %79 : vector<2x32xf32>
    %cst_42 = arith.constant 1.000000e+00 : f32
    %81 = vector.broadcast %cst_42 : f32 to vector<2x32xf32>
    %82 = arith.addf %81, %80 : vector<2x32xf32>
    %83 = arith.divf %81, %82 : vector<2x32xf32>
    %84 = arith.mulf %75, %5 : vector<2x32xf32>
    %85 = arith.mulf %69, %77 : vector<2x32xf32>
    %86 = arith.addf %84, %85 : vector<2x32xf32>
    %87 = math.tanh %86 : vector<2x32xf32>
    %88 = arith.mulf %83, %87 : vector<2x32xf32>
    %c0_43 = arith.constant 0 : index
    %c0_44 = arith.constant 0 : index
    %89 = vector.load %arg5[%c0_43, %c0_44] : memref<2x1xi32, #tpu.memory_space<vmem>>, vector<2x1xi32>
    %90 = vector.broadcast %arg1 : i32 to vector<2x1xi32>
    %91 = arith.cmpi sgt, %89, %90 : vector<2x1xi32>
    %92 = vector.shape_cast %91 : vector<2x1xi1> to vector<2x1xi1>
    %93 = vector.broadcast %92 : vector<2x1xi1> to vector<2x32xi1>
    %94 = arith.select %93, %88, %4 : vector<2x32xi1>, vector<2x32xf32>
    %c0_45 = arith.constant 0 : index
    %c0_46 = arith.constant 0 : index
    %95 = vector.load %arg21[%c0_45, %c0_46] : memref<2x32xf32, #tpu.memory_space<vmem>>, vector<2x32xf32>
    tpu.vector_store %arg21[%c0_45, %c0_46], %94 {strides = array<i32>} : memref<2x32xf32, #tpu.memory_space<vmem>>, vector<2x32xf32>,
    %96 = vector.shape_cast %91 : vector<2x1xi1> to vector<2x1xi1>
    %97 = vector.broadcast %96 : vector<2x1xi1> to vector<2x32xi1>
    %98 = arith.select %97, %86, %5 : vector<2x32xi1>, vector<2x32xf32>
    %c0_47 = arith.constant 0 : index
    %c0_48 = arith.constant 0 : index
    %99 = vector.load %arg22[%c0_47, %c0_48] : memref<2x32xf32, #tpu.memory_space<vmem>>, vector<2x32xf32>
    tpu.vector_store %arg22[%c0_47, %c0_48], %98 {strides = array<i32>} : memref<2x32xf32, #tpu.memory_space<vmem>>, vector<2x32xf32>,
    %100 = arith.truncf %88 : vector<2x32xf32> to vector<2x32xbf16>
    %c0_49 = arith.constant 0 : index
    %c0_50 = arith.constant 0 : index
    %c0_51 = arith.constant 0 : index
    %101 = vector.load %arg19[%c0_49, %c0_50, %c0_51] : memref<1x2x32xbf16, #tpu.memory_space<vmem>>, vector<1x2x32xbf16>
    %102 = vector.shape_cast %101 : vector<1x2x32xbf16> to vector<2x32xbf16>
    %103 = vector.shape_cast %100 : vector<2x32xbf16> to vector<1x2x32xbf16>
    tpu.vector_store %arg19[%c0_49, %c0_50, %c0_51], %103 {strides = array<i32>} : memref<1x2x32xbf16, #tpu.memory_space<vmem>>, vector<1x2x32xbf16>,
    %c0_52 = arith.constant 0 : index
    %c0_53 = arith.constant 0 : index
    %c0_54 = arith.constant 0 : index
    %104 = vector.load %arg20[%c0_52, %c0_53, %c0_54] : memref<1x2x16xf32, #tpu.memory_space<vmem>>, vector<1x2x16xf32>
    %105 = vector.shape_cast %104 : vector<1x2x16xf32> to vector<2x16xf32>
    %106 = vector.shape_cast %35 : vector<2x16xf32> to vector<1x2x16xf32>
    tpu.vector_store %arg20[%c0_52, %c0_53, %c0_54], %106 {strides = array<i32>} : memref<1x2x16xf32, #tpu.memory_space<vmem>>, vector<1x2x16xf32>,
    return
  }
  func.func @transform_0(%arg0: i32, %arg1: i32) -> (i32, i32, i32) {
    %c0_i32 = arith.constant 0 : i32
    %c0_i32_0 = arith.constant 0 : i32
    %c0_i32_1 = arith.constant 0 : i32
    return %arg0, %c0_i32, %c0_i32_0 : i32, i32, i32
  }
  func.func @transform_1(%arg0: i32, %arg1: i32) -> (i32, i32, i32) {
    %c0_i32 = arith.constant 0 : i32
    %c0_i32_0 = arith.constant 0 : i32
    %c0_i32_1 = arith.constant 0 : i32
    return %arg0, %c0_i32, %c0_i32_0 : i32, i32, i32
  }
  func.func @transform_2(%arg0: i32, %arg1: i32) -> (i32, i32, i32) {
    %c0_i32 = arith.constant 0 : i32
    %c0_i32_0 = arith.constant 0 : i32
    return %arg1, %arg0, %c0_i32 : i32, i32, i32
  }
  func.func @transform_3(%arg0: i32, %arg1: i32) -> (i32, i32) {
    %c0_i32 = arith.constant 0 : i32
    %c0_i32_0 = arith.constant 0 : i32
    return %arg0, %c0_i32 : i32, i32
  }
  func.func @transform_4(%arg0: i32, %arg1: i32) -> (i32, i32) {
    %c0_i32 = arith.constant 0 : i32
    %c0_i32_0 = arith.constant 0 : i32
    %c0_i32_1 = arith.constant 0 : i32
    return %c0_i32, %c0_i32_0 : i32, i32
  }
  func.func @transform_5(%arg0: i32, %arg1: i32) -> (i32, i32) {
    %c0_i32 = arith.constant 0 : i32
    %c0_i32_0 = arith.constant 0 : i32
    %c0_i32_1 = arith.constant 0 : i32
    return %c0_i32, %c0_i32_0 : i32, i32
  }
  func.func @transform_6(%arg0: i32, %arg1: i32) -> (i32, i32) {
    %c0_i32 = arith.constant 0 : i32
    %c0_i32_0 = arith.constant 0 : i32
    %c0_i32_1 = arith.constant 0 : i32
    return %c0_i32, %c0_i32_0 : i32, i32
  }
  func.func @transform_7(%arg0: i32, %arg1: i32) -> (i32, i32) {
    %c0_i32 = arith.constant 0 : i32
    %c0_i32_0 = arith.constant 0 : i32
    %c0_i32_1 = arith.constant 0 : i32
    return %c0_i32, %c0_i32_0 : i32, i32
  }
  func.func @transform_8(%arg0: i32, %arg1: i32) -> (i32, i32) {
    %c0_i32 = arith.constant 0 : i32
    %c0_i32_0 = arith.constant 0 : i32
    %c0_i32_1 = arith.constant 0 : i32
    return %c0_i32, %c0_i32_0 : i32, i32
  }
  func.func @transform_9(%arg0: i32, %arg1: i32) -> (i32, i32) {
    %c0_i32 = arith.constant 0 : i32
    %c0_i32_0 = arith.constant 0 : i32
    %c0_i32_1 = arith.constant 0 : i32
    return %c0_i32, %c0_i32_0 : i32, i32
  }
  func.func @transform_10(%arg0: i32, %arg1: i32) -> (i32, i32) {
    %c0_i32 = arith.constant 0 : i32
    %c0_i32_0 = arith.constant 0 : i32
    %c0_i32_1 = arith.constant 0 : i32
    return %c0_i32, %c0_i32_0 : i32, i32
  }
  func.func @transform_11(%arg0: i32, %arg1: i32) -> (i32, i32) {
    %c0_i32 = arith.constant 0 : i32
    %c0_i32_0 = arith.constant 0 : i32
    %c0_i32_1 = arith.constant 0 : i32
    return %c0_i32, %c0_i32_0 : i32, i32
  }
  func.func @transform_12(%arg0: i32, %arg1: i32) -> (i32, i32) {
    %c0_i32 = arith.constant 0 : i32
    %c0_i32_0 = arith.constant 0 : i32
    %c0_i32_1 = arith.constant 0 : i32
    return %c0_i32, %c0_i32_0 : i32, i32
  }
  func.func @transform_13(%arg0: i32, %arg1: i32) -> (i32, i32) {
    %c0_i32 = arith.constant 0 : i32
    %c0_i32_0 = arith.constant 0 : i32
    %c0_i32_1 = arith.constant 0 : i32
    return %c0_i32, %c0_i32_0 : i32, i32
  }
  func.func @transform_14(%arg0: i32, %arg1: i32) -> (i32, i32) {
    %c0_i32 = arith.constant 0 : i32
    %c0_i32_0 = arith.constant 0 : i32
    %c0_i32_1 = arith.constant 0 : i32
    return %c0_i32, %c0_i32_0 : i32, i32
  }
  func.func @transform_15(%arg0: i32, %arg1: i32) -> (i32, i32) {
    %c0_i32 = arith.constant 0 : i32
    %c0_i32_0 = arith.constant 0 : i32
    %c0_i32_1 = arith.constant 0 : i32
    return %c0_i32, %c0_i32_0 : i32, i32
  }
  func.func @transform_16(%arg0: i32, %arg1: i32) -> (i32, i32) {
    %c0_i32 = arith.constant 0 : i32
    %c0_i32_0 = arith.constant 0 : i32
    %c0_i32_1 = arith.constant 0 : i32
    return %c0_i32, %c0_i32_0 : i32, i32
  }
  func.func @transform_17(%arg0: i32, %arg1: i32) -> (i32, i32, i32) {
    %c0_i32 = arith.constant 0 : i32
    %c0_i32_0 = arith.constant 0 : i32
    return %arg1, %arg0, %c0_i32 : i32, i32, i32
  }
  func.func @transform_18(%arg0: i32, %arg1: i32) -> (i32, i32, i32) {
    %c0_i32 = arith.constant 0 : i32
    %c0_i32_0 = arith.constant 0 : i32
    return %arg1, %arg0, %c0_i32 : i32, i32, i32
  }
}

</mosaic_0001>

<bundles_post_ra>
// kernel: tpu_custom_call.1
= control target key start
LH: loop header
LB: loop body
LE: loop exit
PB: predicated region body
PF: predicated region fallthrough
CT: control target
= control target key end

     0   :  { %s3260_s0 = inlined_call_operand.vmem [shape: bf16[2,16,32], index: 0, kind: input, shape index: {}]   ;;  %s3261_s1 = inlined_call_operand.hbm [shape: bf16[2,16,16], index: 1, kind: input, shape index: {}]   ;;  %s3262_s2 = inlined_call_operand.hbm [shape: bf16[5,2,128], index: 2, kind: input, shape index: {}]   ;;  %s3263_s3 = inlined_call_operand.vmem [shape: s32[2,1], index: 3, kind: input, shape index: {}]   ;;  %s3264_s4 = inlined_call_operand.vmem [shape: bf16[32,16], index: 4, kind: input, shape index: {}]   ;;  %s3265_s5 = inlined_call_operand.hbm [shape: f32[1,16], index: 5, kind: input, shape index: {}]   ;;  %s3266_s6 = inlined_call_operand.hbm [shape: f32[1,16], index: 6, kind: input, shape index: {}]   ;;  %s3267_s7 = inlined_call_operand.<no memory space> [shape: f32[1,1], index: 7, kind: input, shape index: {}]   ;;  %s3268_s8 = inlined_call_operand.vmem [shape: bf16[32,32], index: 8, kind: input, shape index: {}]   ;;  %s3269_s9 = inlined_call_operand.hbm [shape: f32[1,32], index: 9, kind: input, shape index: {}]   ;;  %s3270_s10 = inlined_call_operand.hbm [shape: bf16[32,128], index: 10, kind: input, shape index: {}]   ;;  %s3271_s11 = inlined_call_operand.hbm [shape: bf16[32,128], index: 11, kind: input, shape index: {}]   ;;  %s3272_s12 = inlined_call_operand.hbm [shape: f32[1,128], index: 12, kind: input, shape index: {}]   ;;  %s3273_s13 = inlined_call_operand.vmem [shape: bf16[32,32], index: 13, kind: input, shape index: {}]   ;;  %s3274_s14 = inlined_call_operand.vmem [shape: f32[1,32], index: 14, kind: input, shape index: {}]   ;;  %s3275_s15 = inlined_call_operand.hbm [shape: bf16[32,32], index: 15, kind: input, shape index: {}]   ;;  %s3276_s16 = inlined_call_operand.vmem [shape: f32[1,32], index: 16, kind: input, shape index: {}]   ;;  %s3277_s17 = inlined_call_operand.hbm [shape: bf16[5,2,32], index: 17, kind: output, shape index: {0}]   ;;  %s3278_s18 = inlined_call_operand.hbm [shape: f32[5,2,16], index: 18, kind: output, shape index: {1}]  }
   0x1   :  { %3289 = sst [smem:[#allocation32_spill]] %s3260_s0  ;;  %v24_v0 = vstv %s3267_s7 }
   0x2   :  { %3290 = sst [smem:[#allocation33_spill]] %s3261_s1  ;;  %25 = vst [vmem:[#allocation4] sm:$0x1] %v24_v0 }
   0x3   :  { %3291 = sst [smem:[#allocation34_spill]] %s3262_s2 }
   0x4   :  { %3292 = sst [smem:[#allocation35_spill]] %s3263_s3 }
   0x5   :  { %3293 = sst [smem:[#allocation36_spill]] %s3265_s5 }
   0x6   :  { %3294 = sst [smem:[#allocation37_spill]] %s3266_s6 }
   0x7   :  { %3295 = sst [smem:[#allocation38_spill]] %s3269_s9 }
   0x8   :  { %3296 = sst [smem:[#allocation39_spill]] %s3270_s10 }
   0x9   :  { %3297 = sst [smem:[#allocation40_spill]] %s3271_s11 }
   0xa   :  { %3298 = sst [smem:[#allocation41_spill]] %s3272_s12 }
   0xb   :  { %3299 = sst [smem:[#allocation42_spill]] %s3275_s15 }
   0xc   :  { %3300 = sst [smem:[#allocation43_spill]] %s3277_s17 }
   0xd   :  { %3301 = sst [smem:[#allocation44_spill]] %s3278_s18 }
   0xe   :  { %26 = vsyncpa [#allocation6], 0 }
   0xf   :  { %27 = vsyncpa [#allocation9], 0 }
  0x10   :  { %29 = vsyncpa [#allocation9 + $0x1], 0 }
  0x11   :  { %30 = vsyncpa [#allocation12], 0 }
  0x12   :  { %31 = vsyncpa [#allocation15], 0 }
  0x13   :  { %32 = vsyncpa [#allocation18], 0 }
  0x14   :  { %33 = vsyncpa [#allocation7], 0 }
  0x15   :  { %35 = vsyncpa [#allocation7 + $0x1], 0 }
  0x16   :  { %36 = vsyncpa [#allocation22], 0 }
  0x17   :  { %38 = vsyncpa [#allocation22 + $0x1], 0  ;;  %s2782_s29 = smov 0   ;;  %s2784_s30 = smov 0  }
  0x18   :  { %s2786_s0 = smov 0   ;;  %s2788_s19 = smov 0  }
  0x19   :  { %s2790_s7 = smov 0   ;;  %s2792_s1 = smov 0  }
  0x1a LB: > { %s2661_s20 = smov [#allocation10]   ;;  %s2813_s22 = sadd.s32 4294967295, %s2659_s1   ;;  %s2659_s1 = sphi %s2792_s1, %s44_s1   ;;  %s2655_s7 = sphi %s2790_s7, %s3345_s7   ;;  %s2651_s19 = sphi %s2788_s19, %s3344_s19   ;;  %s2647_s0 = sphi %s2786_s0, %s3343_s0   ;;  %s2643_s30 = sphi %s2784_s30, %s3342_s30   ;;  %s2639_s29 = sphi %s2782_s29, %s3341_s29  }
  0x1b   : > { %s546_s21 = sshll.u32 %s2661_s20, 4  ;;  %p1944_p0 = scmp.ge.s32.totalorder %s2659_s1, 1  ;;  %s547_s21 = int_to_ptr.vmem [resolvable:$true] %s546_s21 }
  0x1c   : > { %p3282_p1 = scmp.eq.s32.totalorder %s2813_s22, 0  ;;  %p496_p2 = scmp.lt.s32.totalorder %s2659_s1, 6 }
  0x1d   : > { %s2662_s23 = smov [#allocation11]   ;;  %s2663_s26 = smov [#allocation14]  }
  0x1e   : > { %p2818_p3 = pnand %p1944_p0, %p496_p2  ;;  %s557_s24 = sshll.u32 %s2662_s23, 4  ;;  %s558_s24 = int_to_ptr.vmem [resolvable:$true] %s557_s24 }
  0x1f   : > { %s584_s27 = sshll.u32 %s2663_s26, 4  ;;  %s2304_s20 = scalar_lea.vmem %s547_s21, 16  ;;  %s2830_s27 = int_to_ptr.vmem [resolvable:$true] %s584_s27 }
  0x20   : > { %s3302_s2 = scalar_select %p2818_p3, 1, 0 }
  0x21   : > { %p2133_p4 = pneg %p2818_p3  ;;  %p2305_p7 = scmp.ne.s32.totalorder %s547_s21, %s2304_s20 }
  0x22   : > { %s2311_s23 = scalar_lea.vmem %s547_s21, 32  ;;  %p2312_p10 = scmp.lt.s32.totalorder %s547_s21, %s547_s21 }
  0x23   : > { %p2826_p5 = pnand %p2133_p4, %p3282_p1  ;;  %p2313_p11 = scmp.lt.s32.totalorder %s2311_s23, %s2304_s20 }
  0x25   : > { %p2834_p6 = pneg %p2826_p5  ;;  %p2314_p12 = por %p2313_p11, %p2312_p10 }
  0x27   : > { %p2307_p8 = pnand %p2305_p7, %p2834_p6 }
  0x29   : > { %p2308_p9 = pneg %p2307_p8 }
  0x2b   : > { %p2315_p13 = pnand %p2314_p12, %p2308_p9 }
  0x2d   : > { %2318 = shalt.err (!%p2315_p13)
}
  0x2e   : > { %s3305_s5 = sld [smem:[#allocation36_spill]]  ;;  %s2330_s18 = scalar_lea.vmem %s558_s24, 16 }
  0x2f   : > { %p2331_p0 = scmp.ne.s32.totalorder %s558_s24, %s2330_s18  ;;  %s2337_s3 = scalar_lea.vmem %s558_s24, 32 }
  0x30   : > { %p2338_p7 = scmp.lt.s32.totalorder %s558_s24, %s558_s24  ;;  %p2339_p8 = scmp.lt.s32.totalorder %s2337_s3, %s2330_s18 }
  0x31   : > { %p2333_p2 = pnand %p2331_p0, %p2834_p6 }
  0x32   : > { %p2340_p1 = por %p2339_p8, %p2338_p7 }
  0x33   : > { %p2334_p4 = pneg %p2333_p2 }
  0x34   : > { %2139 = dma.hbm_to_vmem [thread:$0]  (!%p2826_p5), %s3305_s5, 16, %s547_s21, [#allocation9]  }
  0x35   : > { %p2341_p3 = pnand %p2340_p1, %p2334_p4 }
  0x37   : > { %2344 = shalt.err (!%p2341_p3)
}
  0x38   : > { %s3306_s6 = sld [smem:[#allocation37_spill]]  ;;  %s2356_s17 = scalar_lea.vmem %s2830_s27, 256 }
  0x39   : > { %p2357_p9 = scmp.ne.s32.totalorder %s2830_s27, %s2356_s17  ;;  %p2364_p12 = scmp.lt.s32.totalorder %s2830_s27, %s2830_s27 }
  0x3a   : > { %p2365_p13 = scmp.lt.s32.totalorder %s2356_s17, %s2356_s17 }
  0x3b   : > { %p2359_p10 = pnand %p2357_p9, %p2834_p6 }
  0x3c   : > { %p2366_p1 = por %p2365_p13, %p2364_p12 }
  0x3d   : > { %p2360_p11 = pneg %p2359_p10 }
  0x3e   : > { %2142 = dma.hbm_to_vmem [thread:$0]  (!%p2826_p5), %s3306_s6, 16, %s558_s24, [#allocation12]  }
  0x3f   : > { %p2367_p3 = pnand %p2366_p1, %p2360_p11 }
  0x41   : > { %2370 = shalt.err (!%p2367_p3)
}
  0x42   : > { %s3284_s3 = smov 64   ;;  %s3286_s18 = smov 4  }
  0x43   : > { %s3307_s10 = sld [smem:[#allocation39_spill]]  ;;  %s2666_s26 = smov [#allocation17]  }
  0x44   : > { %s611_s20 = sshll.u32 %s2666_s26, 4  ;;  %s612_s20 = int_to_ptr.vmem [resolvable:$true] %s611_s20 }
  0x45   : > { %s2382_s23 = scalar_lea.vmem %s612_s20, 16  ;;  %s2389_s17 = scalar_lea.vmem %s612_s20, 32 }
  0x46   : > { %p2383_p0 = scmp.ne.s32.totalorder %s612_s20, %s2382_s23  ;;  %p2390_p7 = scmp.lt.s32.totalorder %s612_s20, %s612_s20 }
  0x47   : > { %p2391_p8 = scmp.lt.s32.totalorder %s2389_s17, %s2382_s23 }
  0x48   : > { %p2385_p2 = pnand %p2383_p0, %p2834_p6 }
  0x49   : > { %2148 = dma.hbm_to_vmem [thread:$0]  (!%p2826_p5), %s3307_s10, 256, %s2830_s27, [#allocation15], %s3284_s3, %s3284_s3, %s3286_s18  }
  0x4a   : > { %p2386_p4 = pneg %p2385_p2  ;;  %p2392_p9 = por %p2391_p8, %p2390_p7 }
  0x4c   : > { %p2393_p10 = pnand %p2392_p9, %p2386_p4 }
  0x4e   : > { %2396 = shalt.err (!%p2393_p10)
}
  0x4f   : > { %s3308_s12 = sld [smem:[#allocation41_spill]]  ;;  %s2667_s27 = smov [#allocation5]  }
  0x50   : > { %s522_s21 = sshll.u32 %s2667_s27, 4  ;;  %s2668_s24 = smov [#allocation13]   ;;  %s523_s21 = int_to_ptr.vmem [resolvable:$true] %s522_s21 }
  0x51   : > { %s574_s26 = sshll.u32 %s2668_s24, 4  ;;  %s2408_s3 = scalar_lea.vmem %s523_s21, 256  ;;  %s575_s26 = int_to_ptr.vmem [resolvable:$true] %s574_s26 }
  0x52   : > { %p2409_p11 = scmp.ne.s32.totalorder %s523_s21, %s2408_s3  ;;  %p2416_p1 = scmp.lt.s32.totalorder %s523_s21, %s523_s21 }
  0x53   : > { %p2417_p3 = scmp.lt.s32.totalorder %s2408_s3, %s2408_s3 }
  0x54   : > { %p2411_p12 = pnand %p2409_p11, %p2834_p6 }
  0x55   : > { %2154 = dma.hbm_to_vmem [thread:$0]  (!%p2826_p5), %s3308_s12, 16, %s612_s20, [#allocation18]  }
  0x56   : > { %p2412_p13 = pneg %p2411_p12  ;;  %p2418_p0 = por %p2417_p3, %p2416_p1 }
  0x58   : > { %p2419_p2 = pnand %p2418_p0, %p2412_p13 }
  0x5a   : > { %2422 = shalt.err (!%p2419_p2)
}
  0x5b   : > { %s3309_s5 = smov 64   ;;  %s3310_s23 = sld [smem:[#allocation33_spill]] }
  0x5c   : > { %s2434_s17 = scalar_lea.vmem %s575_s26, 16  ;;  %s2441_s27 = scalar_lea.vmem %s575_s26, 32 }
  0x5d   : > { %p2435_p4 = scmp.ne.s32.totalorder %s575_s26, %s2434_s17  ;;  %p2442_p9 = scmp.lt.s32.totalorder %s575_s26, %s575_s26 }
  0x5e   : > { %p2443_p10 = scmp.lt.s32.totalorder %s2441_s27, %s2434_s17 }
  0x5f   : > { %p2437_p7 = pnand %p2435_p4, %p2834_p6 }
  0x60   : > { %p2444_p11 = por %p2443_p10, %p2442_p9 }
  0x61   : > { %2136 = dma.hbm_to_vmem [thread:$0]  (!%p2826_p5), %s3310_s23, 256, %s523_s21, [#allocation6], %s3309_s5, %s3309_s5, %s3286_s18  }
  0x62   : > { %p2438_p8 = pneg %p2437_p7 }
  0x64   : > { %p2445_p12 = pnand %p2444_p11, %p2438_p8 }
  0x66   : > { %2448 = shalt.err (!%p2445_p12)
}
  0x67   : > { %s3311_s9 = sld [smem:[#allocation38_spill]]  ;;  %s2669_s6 = smov [#allocation16]  }
  0x68   : > { %s597_s21 = sshll.u32 %s2669_s6, 4  ;;  %s2670_s20 = smov [#allocation19]   ;;  %s598_s21 = int_to_ptr.vmem [resolvable:$true] %s597_s21 }
  0x69   : > { %s627_s23 = sshll.u32 %s2670_s20, 4  ;;  %s2460_s18 = scalar_lea.vmem %s598_s21, 256  ;;  %s628_s23 = int_to_ptr.vmem [resolvable:$true] %s627_s23 }
  0x6a   : > { %p2461_p13 = scmp.ne.s32.totalorder %s598_s21, %s2460_s18  ;;  %p2468_p0 = scmp.lt.s32.totalorder %s598_s21, %s598_s21 }
  0x6b   : > { %p2469_p2 = scmp.lt.s32.totalorder %s2460_s18, %s2460_s18 }
  0x6c   : > { %p2463_p1 = pnand %p2461_p13, %p2834_p6 }
  0x6d   : > { %2145 = dma.hbm_to_vmem [thread:$0]  (!%p2826_p5), %s3311_s9, 16, %s575_s26, [#allocation12]  }
  0x6e   : > { %p2464_p3 = pneg %p2463_p1  ;;  %p2470_p4 = por %p2469_p2, %p2468_p0 }
  0x70   : > { %p2471_p7 = pnand %p2470_p4, %p2464_p3 }
  0x72   : > { %2474 = shalt.err (!%p2471_p7)
}
  0x73   : > { %s3312_s17 = smov 4   ;;  %s3313_s11 = sld [smem:[#allocation40_spill]] }
  0x74   : > { %s2486_s3 = scalar_lea.vmem %s628_s23, 256  ;;  %p2494_p11 = scmp.lt.s32.totalorder %s628_s23, %s628_s23 }
  0x75   : > { %p2487_p8 = scmp.ne.s32.totalorder %s628_s23, %s2486_s3  ;;  %p2495_p12 = scmp.lt.s32.totalorder %s2486_s3, %s2486_s3 }
  0x77   : > { %p2489_p9 = pnand %p2487_p8, %p2834_p6  ;;  %p2496_p13 = por %p2495_p12, %p2494_p11 }
  0x79   : > { %2151 = dma.hbm_to_vmem [thread:$0]  (!%p2826_p5), %s3313_s11, 256, %s598_s21, [#allocation15], %s3309_s5, %s3309_s5, %s3312_s17  }
  0x7a   : > { %p2490_p10 = pneg %p2489_p9 }
  0x7c   : > { %p2497_p1 = pnand %p2496_p13, %p2490_p10 }
  0x7e   : > { %2500 = shalt.err (!%p2497_p1)
}
  0x7f   : > { %s3314_s15 = sld [smem:[#allocation42_spill]]  ;;  %s1943_s25 = sadd.s32 4294967294, %s2659_s1  }
  0x80   : > { %s53_s28 = sadd.s32 1, %s2655_s7  ;;  %s117_s6 = sadd.s32 1, %s2647_s0 }
  0x81   : > { %p54_p6 = scmp.ge.s32.totalorder %s53_s28, 5  ;;  %p124_p3 = scmp.ne.s32.totalorder %s2647_s0, %s2643_s30 }
  0x82   : > { %p125_p0 = scmp.eq.s32.totalorder %s2659_s1, 0  ;;  %p130_p4 = scmp.ne.s32.totalorder %s2643_s30, %s2639_s29 }
  0x83   : > { %s3347_s28 = smov (%p54_p6, %s53_s28), 0  ;;  %p3317_p8 = scmp.eq.s32.totalorder %s2813_s22, 0 }
  0x84   : > { %3315 = sst [smem:[#allocation31_spill]] %s3347_s28  ;;  %p2919_p2 = por %p125_p0, %p124_p3 }
  0x85   : > { %2157 = dma.hbm_to_vmem [thread:$0]  (!%p2826_p5), %s3314_s15, 256, %s628_s23, [#allocation18], %s3309_s5, %s3309_s5, %s3312_s17  }
  0x86   : > { %s112_s5 = ssub.s32 %s2655_s7, %s3347_s28  ;;  %p455_p5 = scmp.eq.s32.totalorder %s2813_s22, 4 }
  0x87   : > { %p115_p7 = scmp.eq.s32.totalorder %s112_s5, 0  ;;  %p2930_p9 = por %p3317_p8, %p130_p4 }
  0x88   : > { %p2934_p10 = por %p455_p5, %p124_p3  ;;  %p461_p11 = scmp.eq.s32.totalorder %s1943_s25, 4 }
  0x89   : > { %s2939_s17 = scalar_select %p115_p7, %s2647_s0, %s117_s6  }
  0x8a   : > { %p2941_p12 = por %p461_p11, %p130_p4  ;;  %p2177_p13 = scmp.lt.s32.totalorder %s2659_s1, 5 }
  0x8b   : > { %s644_s27 = sand.u32 1, %s2659_s1   ;;  %s646_s3 = sand.u32 1, %s2647_s0  }
  0x8c   : > { %s1956_s18 = sshll.u32 %s2655_s7, 4  ;;  %s647_s24 = scalar_lea.vmem [#allocation8], %s646_s3 }
  0x8d   : > { %s655_s5 = sshll.u32 %s647_s24, 4  ;;  %s3321_s11 = sld [smem:[#allocation34_spill]]  ;;  %s656_s5 = int_to_ptr.vmem [resolvable:$true] %s655_s5 }
  0x8e   : > { %p2954_p1 = pnand %p2177_p13, %p2919_p2  ;;  %s645_s6 = scalar_lea.sflag [#allocation9], %s644_s27 }
  0x8f   : > { %s2514_s15 = scalar_lea.vmem %s656_s5, 16  ;;  %s2671_s3 = smov [#allocation8]  }
  0x90   : > { %p2503_p6 = pneg %p2954_p1  ;;  %p2515_p3 = scmp.ne.s32.totalorder %s656_s5, %s2514_s15 }
  0x91   : > { %s2519_s24 = sshll.u32 %s2671_s3, 4  ;;  %s2520_s24 = int_to_ptr.vmem [resolvable:$false] %s2519_s24 }
  0x92   : > { %p2517_p0 = pnand %p2515_p3, %p2503_p6  ;;  %s2521_s28 = scalar_lea.vmem %s2520_s24, 32 }
  0x93   : > { %s653_s12 = scalar_lea.hbm %s3321_s11, %s1956_s18  ;;  %p2522_p5 = scmp.lt.s32.totalorder %s656_s5, %s2520_s24 }
  0x94   : > { %p2518_p4 = pneg %p2517_p0  ;;  %p2523_p7 = scmp.lt.s32.totalorder %s2521_s28, %s2514_s15 }
  0x96   : > { %p2524_p8 = por %p2523_p7, %p2522_p5 }
  0x98   : > { %p2525_p11 = pnand %p2524_p8, %p2518_p4 }
  0x9a   : > { %2528 = shalt.err (!%p2525_p11)
}
  0x9b   : > { %2161 = dma.hbm_to_vmem [thread:$0]  (!%p2954_p1), %s653_s12, 16, %s656_s5, %s645_s6  }
  0x9c   : > { %p3323_p2 = scmp.ne.s32.totalorder %s3302_s2, 0 }
  0x9d   : > { %p3324_p13 = scmp.eq.s32.totalorder (!%p3323_p2), %s2813_s22, 0 }
  0x9e   : > { %664 = sbr.rel (%p3323_p2) target bundleno = 2309 (0x905), region = 88 }
  0xa3   : > { %2606 = dma.done.wait (%p3324_p13), [#allocation6], 256   ;;  %p3325_p6 = pmov %p3324_p13 }
  0xa4   : > { %s670_s9 = sand.u32 1, %s2813_s22   ;;  %s2970_s10 = sand.u32 1, %s2643_s30  }
  0xa5   : > { %2608 = vsyncadd (%p3325_p6), [#allocation6], 4294967040  ;;  %s671_s11 = scalar_lea.sflag [#allocation9], %s670_s9  ;;  %s673_s15 = scalar_lea.vmem [#allocation8], %s2970_s10 }
  0xa6   : > { %2610 = dma.done.wait (%p2930_p9), %s671_s11, 16  }
  0xa7   : > { %2612 = vsyncadd (%p2930_p9), %s671_s11, 4294967280  ;;  %p3326_p1 = pmov %p3325_p6 }
  0xa9   : > { %2614 = dma.done.wait (%p3326_p1), [#allocation9], 16   ;;  %p3327_p3 = pmov %p3326_p1 }
  0xaa   : > { %p3328_p0 = pmov %p3326_p1 }
  0xab   : > { %2616 = vsyncadd (%p3327_p3), [#allocation9], 4294967280 }
  0xac   : > { %2618 = dma.done.wait (%p3328_p0), [#allocation12], 32   ;;  %p3329_p4 = pmov %p3328_p0 }
  0xad   : > { %p3330_p5 = pmov %p3328_p0 }
  0xae   : > { %2620 = vsyncadd (%p3329_p4), [#allocation12], 4294967264 }
  0xaf   : > { %2622 = dma.done.wait (%p3330_p5), [#allocation15], 512   ;;  %p3331_p7 = pmov %p3328_p0 }
  0xb0   : > { %p3332_p9 = pmov %p3328_p0 }
  0xb1   : > { %2624 = vsyncadd (%p3331_p7), [#allocation15], 4294966784 }
  0xb2   : > { %2626 = dma.done.wait (%p3332_p9), [#allocation18], 272   ;;  %p3333_p8 = pmov %p3328_p0 }
  0xb3   : > { %s1966_s12 = sshll.u32 %s2970_s10, 1  ;;  %s3334_s21 = sld [smem:[#allocation32_spill]] }
  0xb4   : > { %2628 = vsyncadd (%p3333_p8), [#allocation18], 4294967024  ;;  %s3015_s3 = scalar_lea.vmem [#allocation21], %s1966_s12  ;;  %p1967_p11 = scmp.ne.s32.totalorder %s2651_s19, 0 }
  0xb6   : > { %787 = sbr.rel (%p1967_p11) target bundleno = 413 (0x19d), region = 128 }
  0xb9   : > { %v2997_v1 = vld [vmem:[%s3334_s21] sm:$0xf]  ;;  %v3002_v2 = vld [vmem:[%s3334_s21 + $0x4] sm:$0xf]  ;;  %v3007_v3 = vld [vmem:[%s3334_s21 + $0x8] sm:$0xf] }
  0xba   : > { %v3012_v4 = vld [vmem:[%s3334_s21 + $0xc] sm:$0xf] }
  0xbb   : > { %v2255_v5 = vld [vmem:[%s3273_s13 + $0x8] sm:$0xff]   ;;  %v788_v6 = vunpack.c.l.bf16 %v2997_v1  ;;  %v789_v7 = vunpack.c.l.bf16 %v3002_v2  ;;  %v790_v8 = vunpack.c.l.bf16 %v3007_v3  ;;  %v2672_v9 = vmov 0.0   ;;  %v2257_v12 = vld [vmem:[%s3273_s13] sm:$0xff]  }
  0xbc   : > { %2035 = vmatprep.subr.bf16.mxu0 %v2672_v9  ;;  %2043 = vmatprep.subr.bf16.mxu1 %v2672_v9  ;;  %v2256_v10 = vld [vmem:[#allocation19 + $0x8] sm:$0xff]   ;;  %v791_v11 = vunpack.c.l.bf16 %v3012_v4  ;;  %vm2673_vm0 = vmmov 0   ;;  %vm792_vm1 = vcmask 261120   ;;  %v2258_v13 = vld [vmem:[#allocation19] sm:$0xff]   ;;  %vm831_vm2 = vcmask 1041409  }
  0xbd   : > { %2036 = vmatpush3.bf16.msra.mxu0 %v2255_v5  ;;  %2039 = vmatprep.mubr.msk.bf16.mxu0 %vm2673_vm0, %v2672_v9  ;;  %v793_v14 = vsel %vm792_vm1, %v788_v6, 0.0  ;;  %v794_v15 = vsel %vm792_vm1, %v789_v7, 0.0  ;;  %v802_v16 = vsel %vm792_vm1, %v790_v8, 0.0  ;;  %v1968_v40 = vld [vmem:[%s3274_s14] ss:$0 sm:$0xff]  ;;  %vm889_vm3 = vcmask 254976  }
  0xbe   : > { %2044 = vmatpush3.bf16.msra.mxu1 %v2256_v10  ;;  %2037 = vmatprep.subr.bf16.mxu0 %v2672_v9  ;;  %v803_v17 = vsel %vm792_vm1, %v791_v11, 0.0  ;;  %v795_v18 = vadd.f32 %v794_v15, %v793_v14  ;;  %v1972_v41 = vld [vmem:[%s3276_s16] ss:$0 sm:$0xff] }
  0xbf   : > { %2045 = vmatprep.subr.bf16.mxu1 %v2672_v9  ;;  %2047 = vmatprep.mubr.msk.bf16.mxu1 %vm2673_vm0, %v2672_v9  ;;  %v804_v19 = vadd.f32 %v803_v17, %v802_v16 }
  0xc0   : > { %v796_v20 = vrot.slane %v795_v18, 4 }
  0xc1   : > { %2038 = vmatpush3.bf16.msra.mxu0 %v2257_v12  ;;  %v805_v21 = vrot.slane %v804_v19, 4 }
  0xc2   : > { %2046 = vmatpush3.bf16.msra.mxu1 %v2258_v13  ;;  %v797_v22 = vadd.f32 %v796_v20, %v795_v18 }
  0xc3   : > { %v806_v23 = vadd.f32 %v805_v21, %v804_v19 }
  0xc4   : > { %v798_v24 = vrot.slane %v797_v22, 2 }
  0xc5   : > { %v807_v25 = vrot.slane %v806_v23, 2 }
  0xc6   : > { %v799_v26 = vadd.f32 %v798_v24, %v797_v22 }
  0xc7   : > { %v808_v27 = vadd.f32 %v807_v25, %v806_v23 }
  0xc8   : > { %v800_v28 = vrot.slane %v799_v26, 1 }
  0xc9   : > { %v809_v29 = vrot.slane %v808_v27, 1 }
  0xca   : > { %v801_v30 = vadd.f32 %v800_v28, %v799_v26 }
  0xcb   : > { %v810_v31 = vadd.f32 %v809_v29, %v808_v27 }
  0xcc   : > { %v812_v32 = vmul.f32 0.0625, %v801_v30 }
  0xcd   : > { %v813_v33 = vmul.f32 0.0625, %v810_v31 }
  0xce   : > { %v814_v34 = vpack.c.bf16 %v812_v32, %v812_v32 }
  0xcf   : > { %v815_v35 = vpack.c.bf16 %v813_v33, %v813_v33 }
  0xd0   : > { %v829_v36 = vunpack.c.l.b16 %v814_v34 }
  0xd1   : > { %v830_v37 = vunpack.c.l.b16 %v815_v35 }
  0xd3   : > { %v832_v38 = vsel %vm831_vm2, %v830_v37, %v829_v36 }
  0xd4   : > { %v833_v39 = vpack.c.b16 %v832_v38, %v832_v38 }
  0xd6   : > { %2040 = vmatmul.mubr.msk.bf16.vlgmr.msra.gmra.mxu0 %vm792_vm1, %v833_v39  ;;  %2048 = vmatmul.mubr.msk.bf16.vlgmr.msra.gmra.mxu1 %vm792_vm1, %v833_v39 }
 0x196   : > { %v883_v42 = vpop.f32.mrf.mxu0  ;;  %v948_v43 = vpop.f32.mrf.mxu1 }
 0x197   : > { %v884_v44 = vadd.f32 %v1968_v40, %v883_v42  ;;  %v949_v45 = vadd.f32 %v1972_v41, %v948_v43 }
 0x198   : > { %v2041_v46 = vpop.f32.mrf.mxu0  ;;  %v2049_v47 = vpop.f32.mrf.mxu1 }
 0x199   : > { %890 = vst.msk [vmem:[#allocation2] sm:$0x3] %vm889_vm3, %v884_v44  ;;  %954 = vst.msk [vmem:[#allocation3] sm:$0x3] %vm889_vm3, %v949_v45 }
 0x19a   : > { %v886_v48 = vpop.f32.mrf.mxu0  ;;  %v951_v49 = vpop.f32.mrf.mxu1 }
 0x19c   : > { %v2042_v50 = vpop.f32.mrf.mxu0  ;;  %v2050_v51 = vpop.f32.mrf.mxu1 }
 0x19d PF: > { %v2261_v52 = vld [vmem:[%s3264_s4 + $0x8] sm:$0xff]   ;;  %v2674_v53 = vmov 0.0   ;;  %v2262_v54 = vld [vmem:[%s3264_s4] sm:$0xff]   ;;  %vm2675_vm4 = vmmov 0   ;;  %vm989_vm5 = vcmask 261120   ;;  %v2676_v57 = vmov 0  }
 0x19e   : > { %2051 = vmatprep.subr.bf16.mxu0 %v2674_v53  ;;  %2059 = vmatprep.subr.bf16.mxu1 %v2674_v53  ;;  %v2677_v58 = vmov 1966171168   ;;  %v1037_v60 = vlaneseq  ;;  %v1976_v63 = vld [vmem:[#allocation10] ss:$0 sm:$0xff]  ;;  %v2005_v8 = vld [vmem:[#allocation5] sm:$0xff]   ;;  %v2012_v12 = vld [vmem:[#allocation5 + $0x8] sm:$0xff]  }
 0x19f   : > { %2052 = vmatpush3.bf16.msra.mxu0 %v2261_v52  ;;  %2055 = vmatprep.mubr.msk.bf16.mxu0 %vm2675_vm4, %v2674_v53  ;;  %v1035_v59 = vunpack.c.l.s4 %v2677_v58  ;;  %v2006_v15 = vunpack.c.l.bf16 %v2005_v8  ;;  %v2007_v16 = vunpack.c.h.bf16 %v2005_v8  ;;  %v2010_v20 = vunpack.c.l.bf16 %v2012_v12  ;;  %v1980_v25 = vld [vmem:[#allocation11] ss:$0 sm:$0xff]  ;;  %v1981_v40 = vld [vmem:[#allocation4] ss:$0 sm:$0xff]  ;;  %s2680_s2 = smov 32   ;;  %s3335_s27 = sld [smem:[#allocation35_spill]] }
 0x1a0   : > { %v3050_v55 = vld [vmem:[#allocation2] sm:$0x3]  ;;  %2053 = vmatprep.subr.bf16.mxu0 %v2674_v53  ;;  %2061 = vmatprep.mubr.msk.bf16.mxu1 %vm2675_vm4, %v2674_v53  ;;  %v3066_v62 = vshrl.u32 %v1037_v60, 7  ;;  %v2011_v21 = vunpack.c.h.bf16 %v2012_v12  ;;  %vm1085_vm6 = vcmask 130048   ;;  %v1117_v42 = vand.u32 127, %v1037_v60  ;;  %s2681_s18 = smov 96  }
 0x1a1   : > { %v3057_v56 = vpack.c.bf16 %v3050_v55, %v3050_v55  ;;  %2259 = vset.pattern.permute.xlu0 %v2676_v57  ;;  %2260 = vset.pattern.permute.xlu1 %v2676_v57  ;;  %v1036_v61 = vunpack.c.0.s8 %v1035_v59  ;;  %vm1127_vm7 = vcmask 130112   ;;  %vm1138_vm8 = vcmask 1041409   ;;  %s2001_s5 = sshll.u32 %s2651_s19, 5  ;;  %s1726_s22 = sshll.u32 %s3015_s3, 4  ;;  %s1727_s22 = int_to_ptr.vmem [resolvable:$true] %s1726_s22 }
 0x1a2   : > { %v3073_v10 = vsub.s32 0, %v3066_v62  ;;  %v1122_v44 = vadd.s32 4294967288, %v1117_v42  ;;  %v3084_v46 = vsub.s32 %v1117_v42, %v3066_v62  ;;  %vm1141_vm9 = vcmask 123904   ;;  %s3336_s9 = sld [smem:[#allocation44_spill]]  ;;  %s1698_s12 = scalar_lea.sflag [#allocation22], %s2970_s10 }
 0x1a3   : > { %2054 = vmatpush3.bf16.msra.mxu0 %v2262_v54  ;;  %v3069_v0 = vsub.s32 %v1036_v61, %v3066_v62  ;;  %v1152_v8 = vsub.s32 1, %v3066_v62  ;;  %s2682_s28 = smov [#allocation21]  }
 0x1a4   : > { %2071 = vmatprep.subr.bf16.mxu0 %v2674_v53  ;;  %v3087_v47 = vsub.s32 %v1122_v44, %v3066_v62  ;;  %s2533_s20 = sshll.u32 %s2682_s28, 4  ;;  %s2534_s20 = int_to_ptr.vmem [resolvable:$false] %s2533_s20 }
 0x1a5   : > { %p2536_p1 = scmp.lt.s32.totalorder %s1727_s22, %s2534_s20 }
 0x1a6   : > { %2056 = vmatmul.mubr.msk.bf16.vlgmr.msra.gmra.mxu0 %vm989_vm5, %v3057_v56 }
 0x1a7   : > { %2075 = vmatprep.mubr.msk.bf16.mxu0 %vm2675_vm4, %v2674_v53 }
 0x1a8   : > { %s1724_s11 = scalar_lea.hbm %s3336_s9, %s2001_s5 }
 0x266   : > { %v1027_v5 = vpop.f32.mrf.mxu0 }
 0x267   : > { %v1028_v6 = vadd.f32 %v1976_v63, %v1027_v5 }
 0x268   : > { %v2057_v7 = vpop.f32.mrf.mxu0 }
 0x269   : > { %v1040_v9 = vrot.slane %v1028_v6, %v3069_v0 }
 0x26a   : > { %v1030_v11 = vpop.f32.mrf.mxu0 }
 0x26b   : > { %v1041_v13 = vcombine.high %v1040_v9, %v1040_v9  ;;  %v1048_v14 = vrot.slane %v1040_v9, %v3069_v0 }
 0x26c   : > { %v2058_v17 = vpop.f32.mrf.mxu0 }
 0x26d   : > { %v1055_v18 = vrot.slane %v1041_v13, %v3069_v0  ;;  %v1059_v19 = vrot.slane %v1048_v14, %v3073_v10 }
 0x26f   : > { %v1066_v22 = vadd.f32 %v2006_v15, %v1059_v19  ;;  %v1063_v23 = vrot.slane %v1055_v18, %v3073_v10  ;;  %v1067_v24 = vadd.f32 %v2007_v16, %v1059_v19 }
 0x271   : > { %v1070_v26 = vmax.f32 %v1066_v22, 0.0  ;;  %v1068_v27 = vadd.f32 %v2010_v20, %v1063_v23  ;;  %v1071_v28 = vmax.f32 %v1067_v24, 0.0  ;;  %v1069_v29 = vadd.f32 %v2011_v21, %v1063_v23 }
 0x273   : > { %v1081_v30 = vmul.f32 %v1980_v25, %v1070_v26  ;;  %v1072_v31 = vmax.f32 %v1068_v27, 0.0  ;;  %v1073_v32 = vmax.f32 %v1069_v29, 0.0  ;;  %v1082_v35 = vmul.f32 %v1980_v25, %v1071_v28 }
 0x275   : > { %v1086_v33 = vsel %vm1085_vm6, %v1081_v30, 0.0  ;;  %v1083_v34 = vmul.f32 %v1980_v25, %v1072_v31  ;;  %v1084_v37 = vmul.f32 %v1980_v25, %v1073_v32  ;;  %v1089_v38 = vsel %vm1085_vm6, %v1082_v35, 0.0 }
 0x276   : > { %1087 = vadd.xlane.f32.xlu0 %v1086_v33 }
 0x277   : > { %v1092_v36 = vsel %vm1085_vm6, %v1083_v34, 0.0  ;;  %v1095_v39 = vsel %vm1085_vm6, %v1084_v37, 0.0  ;;  %v2263_v37 = vld [vmem:[%s3268_s8 + $0x8] sm:$0xff]  }
 0x278   : > { %1093 = vadd.xlane.f32.xlu1 %v1092_v36  ;;  %2072 = vmatpush3.bf16.msra.mxu0 %v2263_v37 }
 0x279   : > { %2073 = vmatprep.subr.bf16.mxu0 %v2674_v53 }
 0x27a   : > { %1090 = vadd.xlane.f32.xlu0 %v1089_v38  ;;  %v2264_v38 = vld [vmem:[%s3268_s8] sm:$0xff]  }
 0x27c   : > { %1096 = vadd.xlane.f32.xlu1 %v1095_v39  ;;  %2074 = vmatpush3.bf16.msra.mxu0 %v2264_v38 }
 0x27d   : > { %2087 = vmatprep.subr.bf16.mxu0 %v2674_v53 }
 0x27f   : > { %2076 = vmatmul.mubr.msk.bf16.vlgmr.msra.gmra.mxu0 %vm989_vm5, %v3057_v56 }
 0x280   : > { %2091 = vmatprep.mubr.msk.bf16.mxu0 %vm2675_vm4, %v2674_v53 }
 0x290   : > { %1105 = vperm.xlu0 %2259, %v1981_v40  }
 0x2ff   : > { %v1088_v41 = vpop.xlane.xlu0 %1087 }
 0x301   : > { %v1094_v43 = vpop.xlane.xlu1 %1093 }
 0x303   : > { %v1091_v45 = vpop.xlane.xlu0 %1090 }
 0x305   : > { %v1097_v48 = vpop.xlane.xlu1 %1096 }
 0x30b   : > { %v1106_v49 = vpop.permute.xlu0 %1105 }
 0x30c   : > { %v1108_v50 = vadd.f32 %v1106_v49, %v1088_v41  ;;  %v1109_v51 = vadd.f32 %v1106_v49, %v1091_v45  ;;  %v1110_v52 = vadd.f32 %v1106_v49, %v1094_v43  ;;  %v1111_v54 = vadd.f32 %v1106_v49, %v1097_v48 }
 0x30e   : > { %v1121_v58 = vrot.slane %v1108_v50, %v3084_v46  ;;  %v1126_v59 = vrot.slane %v1109_v51, %v3087_v47  ;;  %v1132_v60 = vrot.slane %v1110_v52, %v3084_v46  ;;  %v1136_v61 = vrot.slane %v1111_v54, %v3087_v47 }
 0x310   : > { %v1128_v63 = vsel %vm1127_vm7, %v1126_v59, %v1121_v58  ;;  %v1137_v5 = vsel %vm1127_vm7, %v1136_v61, %v1132_v60 }
 0x311   : > { %v1139_v6 = vsel %vm1138_vm8, %v1137_v5, %v1128_v63 }
 0x312   : > { %v1142_v7 = vsel %vm1141_vm9, %v1139_v6, -inf }
 0x313   : > { %1143 = vmax.xlane.f32.xlu1 %v1142_v7 }
 0x33f   : > { %v1419_v60 = vpop.f32.mrf.mxu0 }
 0x341   : > { %v2077_v61 = vpop.f32.mrf.mxu0 }
 0x343   : > { %v1422_v63 = vpop.f32.mrf.mxu0 }
 0x345   : > { %v2078_v5 = vpop.f32.mrf.mxu0 }
 0x346   : > { %v3161_v5 = vld [vmem:[#allocation3] sm:$0x3] }
 0x39c   : > { %v1144_v9 = vpop.xlane.xlu1 %1143 }
 0x39d   : > { %v1149_v11 = vrot.slane %v1144_v9, %v3073_v10  ;;  %v1153_v12 = vrot.slane %v1144_v9, %v1152_v8 }
 0x39f   : > { %v1156_v13 = vsub.f32 %v1108_v50, %v1149_v11  ;;  %v1157_v14 = vsub.f32 %v1109_v51, %v1149_v11  ;;  %v1158_v16 = vsub.f32 %v1110_v52, %v1153_v12  ;;  %v1159_v18 = vsub.f32 %v1111_v54, %v1153_v12 }
 0x3a0   : > { %v1982_v54 = vcombine.low %v2997_v1, %v3002_v2  ;;  %v1984_v2 = vcombine.low %v3007_v3, %v3012_v4  ;;  %v2265_v3 = vld [vmem:[#allocation16 + $0x8] sm:$0xff]   ;;  %v2266_v4 = vld [vmem:[#allocation14 + $0x8] sm:$0xff]  }
 0x3a1   : > { %v1160_v15 = vmul.f32 1.442695, %v1156_v13  ;;  %v1162_v17 = vmul.f32 1.442695, %v1157_v14  ;;  %v1164_v19 = vmul.f32 1.442695, %v1158_v16  ;;  %2088 = vmatpush3.bf16.msra.mxu0 %v2265_v3 }
 0x3a2   : > { %v1166_v20 = vmul.f32 1.442695, %v1159_v18  ;;  %2060 = vmatpush3.bf16.msra.mxu1 %v1982_v54  ;;  %2089 = vmatprep.subr.bf16.mxu0 %v2674_v53  ;;  %v2267_v18 = vld [vmem:[#allocation16] sm:$0xff]  }
 0x3a3   : > { %2269 = vpow2.f32 %v1160_v15  ;;  %2065 = vmatprep.subr.bf16.mxu1 %v2674_v53 }
 0x3a4   : > { %2271 = vpow2.f32 %v1162_v17 }
 0x3a5   : > { %2273 = vpow2.f32 %v1164_v19  ;;  %2090 = vmatpush3.bf16.msra.mxu0 %v2267_v18  ;;  %v2268_v19 = vld [vmem:[#allocation14] sm:$0xff]  }
 0x3a6   : > { %2275 = vpow2.f32 %v1166_v20  ;;  %v1986_v20 = vld [vmem:[#allocation13] ss:$0 sm:$0xff] }
 0x3a8   : > { %2092 = vmatmul.mubr.msk.bf16.vlgmr.msra.gmra.mxu0 %vm989_vm5, %v3057_v56 }
 0x3b0   : > { %v2270_v21 = vpop.eup %2269 }
 0x3b1   : > { %1173 = vperm.xlu1 %2260, %v2270_v21   ;;  %v2272_v22 = vpop.eup %2271 }
 0x3b2   : > { %v2274_v23 = vpop.eup %2273 }
 0x3b3   : > { %v2276_v24 = vpop.eup %2275 }
 0x3b5   : > { %1176 = vperm.xlu1 %2260, %v2272_v22  }
 0x3b9   : > { %1179 = vperm.xlu1 %2260, %v2274_v23  }
 0x3bd   : > { %1182 = vperm.xlu1 %2260, %v2276_v24  }
 0x42c   : > { %v1174_v25 = vpop.permute.xlu1 %1173 }
 0x42d   : > { %v1187_v30 = vrot.slane %v1174_v25, %v3084_v46 }
 0x430   : > { %v1177_v26 = vpop.permute.xlu1 %1176 }
 0x431   : > { %v1191_v28 = vrot.slane %v1177_v26, %v3087_v47 }
 0x433   : > { %v1192_v33 = vsel %vm1127_vm7, %v1191_v28, %v1187_v30 }
 0x434   : > { %v1180_v27 = vpop.permute.xlu1 %1179 }
 0x435   : > { %v1196_v31 = vrot.slane %v1180_v27, %v3084_v46 }
 0x438   : > { %v1183_v29 = vpop.permute.xlu1 %1182 }
 0x439   : > { %v1200_v32 = vrot.slane %v1183_v29, %v3087_v47 }
 0x43b   : > { %v1201_v34 = vsel %vm1127_vm7, %v1200_v32, %v1196_v31 }
 0x43c   : > { %v1202_v35 = vsel %vm1138_vm8, %v1201_v34, %v1192_v33 }
 0x43d   : > { %v1204_v36 = vsel %vm1141_vm9, %v1202_v35, 0.0 }
 0x43e   : > { %1205 = vadd.xlane.f32.xlu1 %v1204_v36 }
 0x468   : > { %v1550_v36 = vpop.f32.mrf.mxu0 }
 0x46a   : > { %v2093_v37 = vpop.f32.mrf.mxu0 }
 0x46c   : > { %v1553_v38 = vpop.f32.mrf.mxu0 }
 0x4c7   : > { %v1206_v39 = vpop.xlane.xlu1 %1205 }
 0x4c8   : > { %v1211_v40 = vrot.slane %v1206_v39, %v3073_v10  ;;  %v1215_v41 = vrot.slane %v1206_v39, %v1152_v8  ;;  %v2094_v39 = vpop.f32.mrf.mxu0 }
 0x4ca   : > { %2277 = vrcp.f32 %v1211_v40  ;;  %v1437_v40 = vld [vmem:[%s673_s15] sm:$0x1]  ;;  %s2679_s15 = smov 64  }
 0x4cb   : > { %2279 = vrcp.f32 %v1215_v41  ;;  %v1438_v41 = vunpack.c.l.bf16 %v1437_v40 }
 0x4d7   : > { %v2278_v42 = vpop.eup %2277 }
 0x4d8   : > { %v3120_v43 = vmul.f32 %v2278_v42, %v2270_v21  ;;  %v3122_v44 = vmul.f32 %v2278_v42, %v2272_v22  ;;  %v2280_v45 = vpop.eup %2279  ;;  %v1420_v21 = vadd.f32 %v1986_v20, %v1419_v60 }
 0x4d9   : > { %v3126_v50 = vmul.f32 %v2280_v45, %v2274_v23  ;;  %v3128_v51 = vmul.f32 %v2280_v45, %v2276_v24 }
 0x4da   : > { %v1224_v48 = vpack.c.bf16 %v3122_v44, %v3120_v43  ;;  %v1990_v22 = vmul.f32 -1.442695, %v1420_v21 }
 0x4db   : > { %v1225_v10 = vpack.c.bf16 %v3128_v51, %v3126_v50 }
 0x4dc   : > { %v1227_v49 = vunpack.c.l.b16 %v1224_v48  ;;  %v1228_v52 = vunpack.c.h.b16 %v1224_v48  ;;  %2281 = vpow2.f32 %v1990_v22  ;;  %v1997_v48 = vld [vmem:[#allocation17] ss:$0 sm:$0xff] }
 0x4dd   : > { %v1295_v58 = vunpack.c.l.b16 %v1225_v10  ;;  %v1296_v59 = vunpack.c.h.b16 %v1225_v10 }
 0x4de   : > { %1230 = vperm.xlu0 %2259, %v1227_v49  }
 0x4e2   : > { %1233 = vperm.xlu0 %2259, %v1228_v52  }
 0x4e6   : > { %1298 = vperm.xlu0 %2259, %v1295_v58  }
 0x4e9   : > { %v2282_v23 = vpop.eup %2281 }
 0x4ea   : > { %1301 = vperm.xlu0 %2259, %v1296_v59   ;;  %v1428_v24 = vadd.f32 1.0, %v2282_v23  ;;  %v2678_v59 = vmov 1983009808  }
 0x4eb   : > { %v1574_v60 = vunpack.c.l.s4 %v2678_v59 }
 0x4ec   : > { %2283 = vrcp.f32 %v1428_v24 }
 0x4ed   : > { %v1575_v61 = vunpack.c.0.s8 %v1574_v60 }
 0x4ef   : > { %v3159_v63 = vsub.s32 %v1575_v61, %v3066_v62 }
 0x4f9   : > { %v2284_v30 = vpop.eup %2283 }
 0x559   : > { %v1231_v6 = vpop.permute.xlu0 %1230 }
 0x55a   : > { %v1238_v8 = vrot.slane %v1231_v6, %v3084_v46 }
 0x55d   : > { %v1234_v7 = vpop.permute.xlu0 %1233 }
 0x55e   : > { %v1242_v9 = vrot.slane %v1234_v7, %v3087_v47  ;;  %v1579_v7 = vrot.slane %v3161_v5, %v3159_v63 }
 0x560   : > { %v1243_v1 = vsel %vm1127_vm7, %v1242_v9, %v1238_v8 }
 0x561   : > { %v1244_v11 = vpack.c.b16 %v1243_v1, %v1243_v1  ;;  %v1299_v12 = vpop.permute.xlu0 %1298 }
 0x562   : > { %v1306_v14 = vrot.slane %v1299_v12, %v3084_v46 }
 0x563   : > { %2062 = vmatmul.mubr.msk.bf16.vlgmr.msra.gmra.mxu1 %vm1085_vm6, %v1244_v11 }
 0x564   : > { %2066 = vmatpush3.bf16.msra.mxu1 %v1984_v2  ;;  %2067 = vmatprep.mubr.msk.bf16.mxu1 %vm2675_vm4, %v2674_v53 }
 0x565   : > { %v1302_v13 = vpop.permute.xlu0 %1301  ;;  %2079 = vmatprep.subr.bf16.mxu1 %v2674_v53 }
 0x566   : > { %v1310_v15 = vrot.slane %v1302_v13, %v3087_v47 }
 0x568   : > { %v1311_v16 = vsel %vm1127_vm7, %v1310_v15, %v1306_v14 }
 0x569   : > { %v1312_v17 = vpack.c.b16 %v1311_v16, %v1311_v16  ;;  %v1600_v16 = vld [vmem:[%s3335_s27] sm:$0x3]  ;;  %s2535_s27 = scalar_lea.vmem %s2534_s20, 64 }
 0x56b   : > { %2068 = vmatmul.mubr.msk.bf16.vlgmr.msra.gmra.mxu1 %vm1085_vm6, %v1312_v17  ;;  %v1601_v17 = vstv %s2651_s19 }
 0x56c   : > { %2083 = vmatprep.mubr.msk.bf16.mxu1 %vm2675_vm4, %v2674_v53  ;;  %2080 = vmatpush3.bf16.msra.mxu1 %v2266_v4  ;;  %vm1602_vm10 = vcmp.gt.s32.totalorder %v1600_v16, %v1601_v17 }
 0x56d   : > { %2081 = vmatprep.subr.bf16.mxu1 %v2674_v53 }
 0x570   : > { %2082 = vmatpush3.bf16.msra.mxu1 %v2268_v19 }
 0x623   : > { %v1288_v25 = vpop.f32.mrf.mxu1 }
 0x625   : > { %v2063_v26 = vpop.f32.mrf.mxu1 }
 0x627   : > { %v1291_v27 = vpop.f32.mrf.mxu1 }
 0x629   : > { %v2064_v28 = vpop.f32.mrf.mxu1 }
 0x62b   : > { %v1356_v29 = vpop.f32.mrf.mxu1 }
 0x62c   : > { %v1433_v53 = vrot.slane %v1356_v29, 7 }
 0x62d   : > { %v2069_v31 = vpop.f32.mrf.mxu1 }
 0x62e   : > { %v1434_v32 = vsel %vm1138_vm8, %v1433_v53, %v1288_v25 }
 0x62f   : > { %v1436_v56 = vmul.f32 %v2284_v30, %v1434_v32  ;;  %v1359_v33 = vpop.f32.mrf.mxu1 }
 0x631   : > { %v1439_v34 = vpack.c.bf16 %v1436_v56, %v1436_v56  ;;  %v2070_v35 = vpop.f32.mrf.mxu1 }
 0x633   : > { %2084 = vmatmul.mubr.msk.bf16.vlgmr.msra.gmra.mxu1 %vm989_vm5, %v1439_v34 }
 0x6f3   : > { %v1493_v42 = vpop.f32.mrf.mxu1 }
 0x6f4   : > { %v1499_v45 = vadd.f32 %v1493_v42, %v1438_v41 }
 0x6f5   : > { %v2085_v49 = vpop.f32.mrf.mxu1 }
 0x6f6   : > { %v1556_v52 = vadd.f32 %v1550_v36, %v1499_v45 }
 0x6f7   : > { %v1496_v10 = vpop.f32.mrf.mxu1 }
 0x6f8   : > { %v1564_v54 = vadd.f32 %v1997_v48, %v1556_v52 }
 0x6f9   : > { %v2086_v58 = vpop.f32.mrf.mxu1 }
 0x6fa   : > { %2285 = vtanh.f32 %v1564_v54  ;;  %v1998_v8 = vmul.f32 -1.442695, %v1564_v54 }
 0x6fc   : > { %2287 = vpow2.f32 %v1998_v8 }
 0x707   : > { %v2286_v6 = vpop.eup %2285 }
 0x708   : > { %1585 = vrot.lane.b32.xlu0 %v2286_v6, %s2679_s15 }
 0x709   : > { %v2288_v9 = vpop.eup %2287 }
 0x70a   : > { %v1568_v1 = vadd.f32 1.0, %v2288_v9 }
 0x70c   : > { %1580 = vrot.lane.b32.xlu0 %v1579_v7, %s2680_s2  ;;  %2289 = vrcp.f32 %v1568_v1 }
 0x719   : > { %v2290_v2 = vpop.eup %2289 }
 0x77a   : > { %v1586_v62 = vpop.permute.xlu0 %1585 }
 0x77b   : > { %v1588_v11 = vmul.f32 %v2290_v2, %v1586_v62 }
 0x77d   : > { %1590 = vrot.lane.b32.xlu0 %v1588_v11, %s2680_s2 }
 0x77e   : > { %v1581_v12 = vpop.permute.xlu0 %1580 }
 0x77f   : > { %v1583_v13 = vmul.f32 %v2290_v2, %v1581_v12 }
 0x781   : > { %1661 = vperm.xlu0 %2259, %v3120_v43  }
 0x785   : > { %1664 = vperm.xlu0 %2259, %v3122_v44   ;;  %v1603_v44 = vsel %vm1602_vm10, 1, %v2676_v57 }
 0x789   : > { %1667 = vperm.xlu0 %2259, %v3126_v50  }
 0x78d   : > { %1670 = vperm.xlu0 %2259, %v3128_v51  }
 0x7ef   : > { %v1591_v14 = vpop.permute.xlu0 %1590 }
 0x7f0   : > { %v1593_v15 = vadd.f32 %v1591_v14, %v1583_v13 }
 0x7f2   : > { %2291 = vtanh.f32 %v1593_v15  ;;  %v1629_v51 = vrot.slane %v1593_v15, %v3159_v63 }
 0x7fc   : > { %v1662_v3 = vpop.permute.xlu0 %1661 }
 0x7fd   : > { %v1675_v20 = vrot.slane %v1662_v3, %v3084_v46 }
 0x7ff   : > { %v2292_v4 = vpop.eup %2291 }
 0x800   : > { %v1665_v43 = vpop.permute.xlu0 %1664  ;;  %1596 = vrot.lane.b32.xlu1 %v2292_v4, %s2679_s15  ;;  %s2529_s15 = scalar_lea.vmem %s1727_s22, 32 }
 0x801   : > { %v1679_v18 = vrot.slane %v1665_v43, %v3087_v47  ;;  %p2530_p2 = scmp.ne.s32.totalorder %s1727_s22, %s2529_s15  ;;  %p2537_p3 = scmp.lt.s32.totalorder %s2535_s27, %s2529_s15 }
 0x803   : > { %v1680_v57 = vsel %vm1127_vm7, %v1679_v18, %v1675_v20  ;;  %p2531_p13 = pnand %p2530_p2, %p2934_p10  ;;  %p2538_p0 = por %p2537_p3, %p2536_p1 }
 0x804   : > { %v1668_v50 = vpop.permute.xlu0 %1667  ;;  %1605 = vperm.xlu1 %2260, %v1603_v44  }
 0x805   : > { %v1684_v21 = vrot.slane %v1668_v50, %v3084_v46  ;;  %p2532_p6 = pneg %p2531_p13 }
 0x807   : > { %p2539_p4 = pnand %p2538_p0, %p2532_p6 }
 0x808   : > { %v1671_v19 = vpop.permute.xlu0 %1670  ;;  %1630 = vrot.lane.b32.xlu1 %v1629_v51, %s2681_s18 }
 0x809   : > { %v1688_v22 = vrot.slane %v1671_v19, %v3087_v47 }
 0x80b   : > { %v1689_v23 = vsel %vm1127_vm7, %v1688_v22, %v1684_v21 }
 0x80c   : > { %v1690_v24 = vsel %vm1138_vm8, %v1689_v23, %v1680_v57 }
 0x80d   : > { %1692 = vst.msk [vmem:[%s3015_s3] sm:$0x3] %vm1141_vm9, %v1690_v24 }
 0x872   : > { %v1597_v25 = vpop.permute.xlu1 %1596 }
 0x873   : > { %v1599_v26 = vmul.f32 %v2290_v2, %v1597_v25 }
 0x874   : > { %2542 = shalt.err (!%p2539_p4)
}
 0x875   : > { %s2543_s3 = scalar_lea.hbm %s1724_s11, 32  ;;  %s2547_s25 = scalar_lea.hbm %s3336_s9, 160 }
 0x876   : > { %p2544_p5 = scmp.ne.s32.totalorder %s1724_s11, %s2543_s3  ;;  %p2548_p8 = scmp.lt.s32.totalorder %s1724_s11, %s3336_s9 }
 0x877   : > { %p2549_p11 = scmp.lt.s32.totalorder %s2547_s25, %s2543_s3 }
 0x878   : > { %p2545_p7 = pnand %p2544_p5, %p2934_p10 }
 0x879   : > { %p2550_p2 = por %p2549_p11, %p2548_p8 }
 0x87a   : > { %p2546_p9 = pneg %p2545_p7 }
 0x87c   : > { %p2551_p13 = pnand %p2550_p2, %p2546_p9 }
 0x87e   : > { %2554 = shalt.err (!%p2551_p13)
}
 0x87f   : > { %2130 = dma.vmem_to_hbm [thread:$0]  (%p2934_p10), %s1727_s22, 32, %s1724_s11, %s1698_s12   ;;  %v1615_v46 = vrot.slane %v1599_v26, %v3159_v63  ;;  %v1635_v47 = vpack.c.bf16 %v1599_v26, %v1599_v26  ;;  %v1606_v29 = vpop.permute.xlu1 %1605  ;;  %vm1620_vm11 = vcmask 254976   ;;  %vm1654_vm13 = vcmask 253952  }
 0x880   : > { %vm1607_vm12 = vcmp.eq.s32.totalorder %v1606_v29, 1  ;;  %s2000_s6 = sshll.u32 %s2651_s19, 4  ;;  %s3337_s22 = scalar_lea.vmem [#allocation20], %s2970_s10 }
 0x881   : > { %v1643_v27 = vrot.slane %v1635_v47, %v3069_v0  ;;  %1616 = vrot.lane.b32.xlu0 %v1615_v46, %s2680_s2  ;;  %s1712_s11 = sshll.u32 %s3337_s22, 4  ;;  %s3338_s15 = sld [smem:[#allocation43_spill]]  ;;  %s1713_s11 = int_to_ptr.vmem [resolvable:$true] %s1712_s11 }
 0x882   : > { %s3339_s20 = smov %s3337_s22  ;;  %s1694_s27 = scalar_lea.sflag [#allocation7], %s2970_s10 }
 0x883   : > { %v1650_v28 = vrot.slane %v1643_v27, %v3069_v0  ;;  %v1631_v30 = vpop.permute.xlu1 %1630  ;;  %s2555_s3 = scalar_lea.vmem %s1713_s11, 16  ;;  %s2683_s19 = smov [#allocation20]  }
 0x884   : > { %v1633_v53 = vsel %vm1607_vm12, %v1631_v30, %v3161_v5  ;;  %p2556_p6 = scmp.ne.s32.totalorder %s1713_s11, %s2555_s3  ;;  %s2559_s18 = sshll.u32 %s2683_s19, 4  ;;  %s2560_s18 = int_to_ptr.vmem [resolvable:$false] %s2559_s18 }
 0x885   : > { %1651 = vrot.lane.b32.xlu0 %v1650_v28, %s2680_s2  ;;  %1634 = vst.msk [vmem:[#allocation3] sm:$0x3] %vm1620_vm11, %v1633_v53  ;;  %s2561_s5 = scalar_lea.vmem %s2560_s18, 32  ;;  %p2562_p0 = scmp.lt.s32.totalorder %s1713_s11, %s2560_s18 }
 0x886   : > { %p2557_p1 = pnand %p2556_p6, %p2934_p10  ;;  %p2563_p4 = scmp.lt.s32.totalorder %s2561_s5, %s2555_s3 }
 0x887   : > { %s3217_s28 = scalar_lea.hbm %s3338_s15, %s2000_s6 }
 0x888   : > { %p2558_p3 = pneg %p2557_p1  ;;  %p2564_p5 = por %p2563_p4, %p2562_p0 }
 0x88a   : > { %p2565_p7 = pnand %p2564_p5, %p2558_p3 }
 0x8f3   : > { %v1617_v31 = vpop.permute.xlu0 %1616 }
 0x8f4   : > { %v1619_v32 = vsel %vm1607_vm12, %v1617_v31, %v3050_v55 }
 0x8f5   : > { %1621 = vst.msk [vmem:[#allocation2] sm:$0x3] %vm1620_vm11, %v1619_v32 }
 0x8f7   : > { %v1652_v0 = vpop.permute.xlu0 %1651 }
 0x8f8   : > { %1655 = vst.msk [vmem:[%s3339_s20] sm:$0x1] %vm1654_vm13, %v1652_v0 }
 0x8f9   : > { %2568 = shalt.err (!%p2565_p7)
}
 0x8fa   : > { %s2569_s25 = scalar_lea.hbm %s3217_s28, 16  ;;  %s2573_s6 = scalar_lea.hbm %s3338_s15, 80 }
 0x8fb   : > { %p2570_p9 = scmp.ne.s32.totalorder %s3217_s28, %s2569_s25  ;;  %p2574_p2 = scmp.lt.s32.totalorder %s3217_s28, %s3338_s15 }
 0x8fc   : > { %p2575_p13 = scmp.lt.s32.totalorder %s2573_s6, %s2569_s25 }
 0x8fd   : > { %p2571_p8 = pnand %p2570_p9, %p2934_p10 }
 0x8fe   : > { %p2576_p6 = por %p2575_p13, %p2574_p2 }
 0x8ff   : > { %p2572_p11 = pneg %p2571_p8 }
 0x901   : > { %p2577_p1 = pnand %p2576_p6, %p2572_p11 }
 0x903   : > { %2580 = shalt.err (!%p2577_p1)
}
 0x904   : > { %2129 = dma.vmem_to_hbm [thread:$0]  (%p2934_p10), %s1713_s11, 16, %s3217_s28, %s1694_s27  }
 0x905 PF: > { %p2186_p3 = scmp.ge.s32.totalorder %s2659_s1, 2  ;;  %s1738_s2 = sand.u32 1, %s2639_s29  }
 0x906   : > { %s1739_s20 = scalar_lea.sflag [#allocation7], %s1738_s2 }
 0x907   : > { %p2163_p0 = pnand %p2186_p3, %p2941_p12 }
 0x909   : > { %p2164_p4 = pneg %p2163_p0 }
 0x90b   : > { %2630 = dma.done.wait (%p2164_p4), %s1739_s20, 16  }
 0x90c   : > { %2632 = vsyncadd (%p2164_p4), %s1739_s20, 4294967280  ;;  %s1747_s3 = scalar_lea.sflag [#allocation22], %s1738_s2 }
 0x90d   : > { %2634 = dma.done.wait (%p2164_p4), %s1747_s3, 32  }
 0x90e   : > { %2636 = vsyncadd (%p2164_p4), %s1747_s3, 4294967264  ;;  %s44_s1 = sadd.s32 1, %s2659_s1   ;;  %s3340_s23 = sld [smem:[#allocation31_spill]] }
 0x90f   : > { %p41_p5 = scmp.ge.s32.totalorder %s44_s1, 7   ;;  %s3341_s29 = smov %s2643_s30 }
 0x910   : > { %s3342_s30 = smov %s2647_s0  ;;  %s3343_s0 = smov %s2939_s17 }
 0x911   : > { %s3344_s19 = smov %s2655_s7  ;;  %43 = sbr.rel (!%p41_p5) target bundleno = 26 (0x1a), region = 194 }
 0x914   : > { %s3345_s7 = smov %s3340_s23 }
 0x916   :  { %1752 = vsyncpa [#allocation6], 1 }
 0x917   :  { %1754 = vsyncpa [#allocation6 + $0x1], 1 }
 0x918   :  { %1755 = vsyncpa [#allocation9], 1 }
 0x919   :  { %1757 = vsyncpa [#allocation9 + $0x1], 1 }
 0x91a   :  { %1758 = vsyncpa [#allocation12], 1 }
 0x91b   :  { %1759 = vsyncpa [#allocation15], 1 }
 0x91c   :  { %1760 = vsyncpa [#allocation18], 1 }
 0x91d   :  { %1761 = vsyncpa [#allocation7], 1 }
 0x91e   :  { %1763 = vsyncpa [#allocation7 + $0x1], 1 }
 0x91f   :  { %1764 = vsyncpa [#allocation22], 1 }
 0x920   :  { %1766 = vsyncpa [#allocation22 + $0x1], 1 }

</bundles_post_ra>
